<compile_context>
chip_gen: v5e
topology: v5e:2x2
jax: 0.10.0
libtpu: 0.0.40
codegen_flags: <defaults>
</compile_context>

<pallas_src>
import jax
import jax.numpy as jnp
from jax import lax
from jax.experimental import pallas as pl
from jax.experimental.pallas import tpu as pltpu


def _hardswish(x):
    return x * jnp.clip(x + 3.0, 0.0, 6.0) * (1.0 / 6.0)


def make_basic_block_kernel(H, W, C, Nb):
    HW = H * W          # flattened spatial extent of one image (lane axis)
    P0 = W + 1          # flattened zero halo on each side (covers the H border)
    HWP = HW + 2 * P0   # padded flattened extent per image
    L = Nb * HW         # lane extent of one grid step (Nb images side by side)

    def kernel(x_ref, w1_ref, s1_ref, b1_ref,
               w2a_ref, s2a_ref, b2a_ref,
               w2b_ref, s2b_ref, b2b_ref,
               out_ref, xp_ref, y1p_ref):
        f32 = jnp.float32

        # Per-lane image-column index; left/right border masks shared by both 3x3 convs.
        lane = lax.broadcasted_iota(jnp.int32, (1, L), 1)
        w_col = lane % W
        not_left = w_col != 0            # tap dx=-1 invalid where w == 0
        not_right = w_col != (W - 1)     # tap dx=+1 invalid where w == W-1

        def im2col(pad_ref):
            # Build the (9C, L) patch matrix from the per-image padded (C, HWP) scratch.
            parts = []
            for dy in (-1, 0, 1):
                for dx in (-1, 0, 1):
                    base = P0 + dy * W + dx              # static offset into padded row
                    if Nb == 1:
                        t = pad_ref[0, :, base:base + HW]
                    else:
                        t = jnp.concatenate(
                            [pad_ref[n, :, base:base + HW] for n in range(Nb)],
                            axis=1)                       # (C, L)
                    if dx == -1:
                        t = jnp.where(not_left, t, 0.0)
                    elif dx == 1:
                        t = jnp.where(not_right, t, 0.0)
                    parts.append(t)
            return jnp.concatenate(parts, axis=0)         # (9C, L)

        # ---- stage the input into the zero-padded scratch (in-kernel halo) ----
        x_imgs = [x_ref[n] for n in range(Nb)]            # each (C, HW), lane-dense
        xp_ref[...] = jnp.zeros(xp_ref.shape, f32)
        for n in range(Nb):
            xp_ref[n, :, P0:P0 + HW] = x_imgs[n]

        # ---- conv1: 3x3 + BN + hardswish (single im2col matmul) ----
        p1 = im2col(xp_ref)                                           # (9C, L)
        a1 = jnp.dot(w1_ref[...], p1, preferred_element_type=f32)     # (C, L)
        y1 = _hardswish(a1 * s1_ref[...] + b1_ref[...])

        # ---- stage y1 into the second padded scratch for the RepVgg 3x3 branch ----
        y1p_ref[...] = jnp.zeros(y1p_ref.shape, f32)
        for n in range(Nb):
            y1p_ref[n, :, P0:P0 + HW] = y1[:, n * HW:(n + 1) * HW]

        # ---- RepVgg branch a: 3x3 + BN + hardswish ----
        p2 = im2col(y1p_ref)
        a2 = jnp.dot(w2a_ref[...], p2, preferred_element_type=f32)
        za = _hardswish(a2 * s2a_ref[...] + b2a_ref[...])

        # ---- RepVgg branch b: 1x1 + BN + hardswish ----
        a3 = jnp.dot(w2b_ref[...], y1, preferred_element_type=f32)
        zb = _hardswish(a3 * s2b_ref[...] + b2b_ref[...])

        # ---- sum branches, ReLU, residual shortcut ----
        y2 = jnp.maximum(za + zb, 0.0)
        for n in range(Nb):
            out_ref[n] = x_imgs[n] + y2[:, n * HW:(n + 1) * HW]

    return kernel, HWP


def basic_block_pallas(x, params, *, block_n=1):
    """x: (N, C, H, W) float32 (NCHW, matching the PyTorch module)."""
    N, C, H, W = x.shape
    assert N % block_n == 0, "batch must be divisible by block_n"
    HW = H * W
    (w1, s1, b1, w2a, s2a, b2a, w2b, s2b, b2b) = params

    # Kernel-side layouts: weights as (C_out, 9*C_in) / (C_out, C_in); BN affine as (C,1).
    w1m = w1.reshape(9 * C, C).T
    w2am = w2a.reshape(9 * C, C).T
    w2bm = w2b.T
    col = lambda v: v.reshape(C, 1)

    x_flat = x.reshape(N, C, HW)      # contiguous reshape; HW goes on the lane axis

    kernel, HWP = make_basic_block_kernel(H, W, C, block_n)

    def rep(shape):                    # replicated (whole-array) operand
        nd = len(shape)
        return pl.BlockSpec(shape, lambda n, _nd=nd: (0,) * _nd)

    out_flat = pl.pallas_call(
        kernel,
        out_shape=jax.ShapeDtypeStruct((N, C, HW), jnp.float32),
        grid=(N // block_n,),
        in_specs=[
            pl.BlockSpec((block_n, C, HW), lambda n: (n, 0, 0)),   # x (residual + conv in)
            rep((C, 9 * C)), rep((C, 1)), rep((C, 1)),             # conv1 / bn1
            rep((C, 9 * C)), rep((C, 1)), rep((C, 1)),             # repvgg 3x3 / bn
            rep((C, C)), rep((C, 1)), rep((C, 1)),                 # repvgg 1x1 / bn
        ],
        out_specs=pl.BlockSpec((block_n, C, HW), lambda n: (n, 0, 0)),
        scratch_shapes=[
            pltpu.VMEM((block_n, C, HWP), jnp.float32),   # padded input scratch
            pltpu.VMEM((block_n, C, HWP), jnp.float32),   # padded y1 scratch
        ],
        compiler_params=pltpu.CompilerParams(
            dimension_semantics=("parallel",)),            # batch steps -> both TCs on v7x
    )(x_flat, w1m, col(s1), col(b1), w2am, col(s2a), col(b2a),
      w2bm, col(s2b), col(b2b))

    return out_flat.reshape(N, C, H, W)


# -------------------- pure-JAX reference for correctness check --------------------
def _conv_bn_hswish_ref(x, w_hwio, scale, bias, padding):
    y = lax.conv_general_dilated(
        x, w_hwio, window_strides=(1, 1), padding=padding,
        dimension_numbers=("NCHW", "HWIO", "NCHW"))
    y = y * scale[None, :, None, None] + bias[None, :, None, None]
    return _hardswish(y)


def basic_block_ref(x, params):
    (w1, s1, b1, w2a, s2a, b2a, w2b, s2b, b2b) = params
    y1 = _conv_bn_hswish_ref(x, w1, s1, b1, [(1, 1), (1, 1)])
    za = _conv_bn_hswish_ref(y1, w2a, s2a, b2a, [(1, 1), (1, 1)])
    zb = _conv_bn_hswish_ref(y1, w2b[None, None, :, :], s2b, b2b, [(0, 0), (0, 0)])
    y2 = jnp.maximum(za + zb, 0.0)
    return x + y2


# -------------------- deterministic parameter init --------------------
def make_params(key, C):
    ks = jax.random.split(key, 16)
    eps = 1e-5

    def bn_fold(kg, kb, km, kv):
        gamma = 1.0 + 0.1 * jax.random.normal(kg, (C,), jnp.float32)
        beta = 0.1 * jax.random.normal(kb, (C,), jnp.float32)
        mean = 0.1 * jax.random.normal(km, (C,), jnp.float32)
        var = jax.random.uniform(kv, (C,), jnp.float32, 0.5, 1.5)
        scale = gamma / jnp.sqrt(var + eps)
        bias = beta - mean * scale
        return scale, bias

    w1 = 0.1 * jax.random.normal(ks[0], (3, 3, C, C), jnp.float32)     # HWIO
    s1, b1 = bn_fold(ks[1], ks[2], ks[3], ks[4])
    w2a = 0.1 * jax.random.normal(ks[5], (3, 3, C, C), jnp.float32)    # HWIO
    s2a, b2a = bn_fold(ks[6], ks[7], ks[8], ks[9])
    w2b = 0.1 * jax.random.normal(ks[10], (C, C), jnp.float32)         # (C_in, C_out)
    s2b, b2b = bn_fold(ks[11], ks[12], ks[13], ks[14])
    return (w1, s1, b1, w2a, s2a, b2a, w2b, s2b, b2b)


if __name__ == "__main__":
    N, C, H, W = 4, 8, 16, 16
    key = jax.random.PRNGKey(0)
    kx, kp = jax.random.split(key)
    x = jax.random.normal(kx, (N, C, H, W), jnp.float32)
    params = make_params(kp, C)

    out = basic_block_pallas(x, params, block_n=2)   # grid=(2,), 2 images per step
    out = jax.block_until_ready(out)

    ref = basic_block_ref(x, params)
    assert out.shape == (N, C, H, W)
    err = float(jnp.max(jnp.abs(out - ref)))
    assert jnp.allclose(out, ref, atol=1e-4, rtol=1e-4), err
    print("KERNEL_OK")
</pallas_src>

<mosaic_0001>
module attributes {stable_mosaic.version = 11 : i64} {
  func.func @kernel(%arg0: i32, %arg1: memref<2x8x256xf32, #tpu.memory_space<vmem>>, %arg2: memref<8x72xf32, #tpu.memory_space<vmem>>, %arg3: memref<8x1xf32, #tpu.memory_space<vmem>>, %arg4: memref<8x1xf32, #tpu.memory_space<vmem>>, %arg5: memref<8x72xf32, #tpu.memory_space<vmem>>, %arg6: memref<8x1xf32, #tpu.memory_space<vmem>>, %arg7: memref<8x1xf32, #tpu.memory_space<vmem>>, %arg8: memref<8x8xf32, #tpu.memory_space<vmem>>, %arg9: memref<8x1xf32, #tpu.memory_space<vmem>>, %arg10: memref<8x1xf32, #tpu.memory_space<vmem>>, %arg11: memref<2x8x256xf32, #tpu.memory_space<vmem>>, %arg12: memref<2x8x290xf32, #tpu.memory_space<vmem>>, %arg13: memref<2x8x290xf32, #tpu.memory_space<vmem>>) attributes {dimension_semantics = [#tpu.dimension_semantics<parallel>], iteration_bounds = array<i64: 2>, scalar_prefetch = 0 : i64, scratch_operands = 2 : i64, tpu.core_type = #tpu.core_type<tc>, window_params = [{transform_indices = @transform_0, window_bounds = array<i64: 2, 8, 256>}, {pipeline_mode = #tpu.pipeline_mode<synchronous>, transform_indices = @transform_1, window_bounds = array<i64: 8, 72>}, {pipeline_mode = #tpu.pipeline_mode<synchronous>, transform_indices = @transform_2, window_bounds = array<i64: 8, 1>}, {pipeline_mode = #tpu.pipeline_mode<synchronous>, transform_indices = @transform_3, window_bounds = array<i64: 8, 1>}, {pipeline_mode = #tpu.pipeline_mode<synchronous>, transform_indices = @transform_4, window_bounds = array<i64: 8, 72>}, {pipeline_mode = #tpu.pipeline_mode<synchronous>, transform_indices = @transform_5, window_bounds = array<i64: 8, 1>}, {pipeline_mode = #tpu.pipeline_mode<synchronous>, transform_indices = @transform_6, window_bounds = array<i64: 8, 1>}, {pipeline_mode = #tpu.pipeline_mode<synchronous>, transform_indices = @transform_7, window_bounds = array<i64: 8, 8>}, {pipeline_mode = #tpu.pipeline_mode<synchronous>, transform_indices = @transform_8, window_bounds = array<i64: 8, 1>}, {pipeline_mode = #tpu.pipeline_mode<synchronous>, transform_indices = @transform_9, window_bounds = array<i64: 8, 1>}, {transform_indices = @transform_10, window_bounds = array<i64: 2, 8, 256>}]} {
    %0 = tpu.iota {dimensions = array<i32: 1>} : vector<1x512xi32>
    %c16_i32 = arith.constant 16 : i32
    %c0_i32 = arith.constant 0 : i32
    %1 = arith.cmpi eq, %c16_i32, %c0_i32 : i32
    %c1_i32 = arith.constant 1 : i32
    %2 = arith.select %1, %c1_i32, %c16_i32 : i32
    %3 = vector.broadcast %2 : i32 to vector<1x512xi32>
    %4 = arith.remsi %0, %3 : vector<1x512xi32>
    %c0_i32_0 = arith.constant 0 : i32
    %5 = vector.broadcast %c0_i32_0 : i32 to vector<1x512xi32>
    %6 = arith.cmpi ne, %4, %5 : vector<1x512xi32>
    %c0_i32_1 = arith.constant 0 : i32
    %7 = vector.broadcast %c0_i32_1 : i32 to vector<1x512xi32>
    %8 = arith.cmpi slt, %4, %7 : vector<1x512xi32>
    %c0_i32_2 = arith.constant 0 : i32
    %9 = arith.cmpi slt, %2, %c0_i32_2 : i32
    %10 = vector.broadcast %9 : i1 to vector<1x512xi1>
    %11 = vector.broadcast %10 : vector<1x512xi1> to vector<1x512xi1>
    %12 = arith.xori %8, %11 : vector<1x512xi1>
    %13 = arith.andi %12, %6 : vector<1x512xi1>
    %14 = vector.broadcast %2 : i32 to vector<1x512xi32>
    %15 = arith.addi %4, %14 : vector<1x512xi32>
    %16 = arith.select %13, %15, %4 : vector<1x512xi1>, vector<1x512xi32>
    %c0_i32_3 = arith.constant 0 : i32
    %17 = vector.broadcast %c0_i32_3 : i32 to vector<1x512xi32>
    %18 = arith.cmpi ne, %16, %17 : vector<1x512xi32>
    %c15_i32 = arith.constant 15 : i32
    %19 = vector.broadcast %c15_i32 : i32 to vector<1x512xi32>
    %20 = arith.cmpi ne, %16, %19 : vector<1x512xi32>
    %c0 = arith.constant 0 : index
    %c0_4 = arith.constant 0 : index
    %c0_5 = arith.constant 0 : index
    %21 = vector.load %arg1[%c0, %c0_4, %c0_5] : memref<2x8x256xf32, #tpu.memory_space<vmem>>, vector<1x8x256xf32>
    %22 = vector.shape_cast %21 : vector<1x8x256xf32> to vector<8x256xf32>
    %c1 = arith.constant 1 : index
    %c0_6 = arith.constant 0 : index
    %c0_7 = arith.constant 0 : index
    %23 = vector.load %arg1[%c1, %c0_6, %c0_7] : memref<2x8x256xf32, #tpu.memory_space<vmem>>, vector<1x8x256xf32>
    %24 = vector.shape_cast %23 : vector<1x8x256xf32> to vector<8x256xf32>
    %cst = arith.constant 0.000000e+00 : f32
    %25 = vector.broadcast %cst : f32 to vector<2x8x290xf32>
    %c0_8 = arith.constant 0 : index
    %c0_9 = arith.constant 0 : index
    %c0_10 = arith.constant 0 : index
    %26 = vector.load %arg12[%c0_8, %c0_9, %c0_10] : memref<2x8x290xf32, #tpu.memory_space<vmem>>, vector<2x8x290xf32>
    tpu.vector_store %arg12[%c0_8, %c0_9, %c0_10], %25 {strides = array<i32>} : memref<2x8x290xf32, #tpu.memory_space<vmem>>, vector<2x8x290xf32>,
    %c0_11 = arith.constant 0 : index
    %c0_12 = arith.constant 0 : index
    %c17 = arith.constant 17 : index
    %27 = vector.load %arg12[%c0_11, %c0_12, %c17] : memref<2x8x290xf32, #tpu.memory_space<vmem>>, vector<1x8x256xf32>
    %28 = vector.shape_cast %27 : vector<1x8x256xf32> to vector<8x256xf32>
    %29 = vector.shape_cast %22 : vector<8x256xf32> to vector<1x8x256xf32>
    tpu.vector_store %arg12[%c0_11, %c0_12, %c17], %29 {strides = array<i32>} : memref<2x8x290xf32, #tpu.memory_space<vmem>>, vector<1x8x256xf32>,
    %c1_13 = arith.constant 1 : index
    %c0_14 = arith.constant 0 : index
    %c17_15 = arith.constant 17 : index
    %30 = vector.load %arg12[%c1_13, %c0_14, %c17_15] : memref<2x8x290xf32, #tpu.memory_space<vmem>>, vector<1x8x256xf32>
    %31 = vector.shape_cast %30 : vector<1x8x256xf32> to vector<8x256xf32>
    %32 = vector.shape_cast %24 : vector<8x256xf32> to vector<1x8x256xf32>
    tpu.vector_store %arg12[%c1_13, %c0_14, %c17_15], %32 {strides = array<i32>} : memref<2x8x290xf32, #tpu.memory_space<vmem>>, vector<1x8x256xf32>,
    %c0_16 = arith.constant 0 : index
    %c0_17 = arith.constant 0 : index
    %c0_18 = arith.constant 0 : index
    %33 = vector.load %arg12[%c0_16, %c0_17, %c0_18] : memref<2x8x290xf32, #tpu.memory_space<vmem>>, vector<1x8x256xf32>
    %34 = vector.shape_cast %33 : vector<1x8x256xf32> to vector<8x256xf32>
    %c1_19 = arith.constant 1 : index
    %c0_20 = arith.constant 0 : index
    %c0_21 = arith.constant 0 : index
    %35 = vector.load %arg12[%c1_19, %c0_20, %c0_21] : memref<2x8x290xf32, #tpu.memory_space<vmem>>, vector<1x8x256xf32>
    %36 = vector.shape_cast %35 : vector<1x8x256xf32> to vector<8x256xf32>
    %37 = tpu.concatenate %34, %36 in 1 : vector<8x256xf32>, vector<8x256xf32> -> vector<8x512xf32>
    %cst_22 = arith.constant 0.000000e+00 : f32
    %38 = vector.shape_cast %18 : vector<1x512xi1> to vector<1x512xi1>
    %39 = vector.broadcast %38 : vector<1x512xi1> to vector<8x512xi1>
    %40 = vector.broadcast %cst_22 : f32 to vector<8x512xf32>
    %41 = arith.select %39, %37, %40 : vector<8x512xi1>, vector<8x512xf32>
    %c0_23 = arith.constant 0 : index
    %c0_24 = arith.constant 0 : index
    %c1_25 = arith.constant 1 : index
    %42 = vector.load %arg12[%c0_23, %c0_24, %c1_25] : memref<2x8x290xf32, #tpu.memory_space<vmem>>, vector<1x8x256xf32>
    %43 = vector.shape_cast %42 : vector<1x8x256xf32> to vector<8x256xf32>
    %c1_26 = arith.constant 1 : index
    %c0_27 = arith.constant 0 : index
    %c1_28 = arith.constant 1 : index
    %44 = vector.load %arg12[%c1_26, %c0_27, %c1_28] : memref<2x8x290xf32, #tpu.memory_space<vmem>>, vector<1x8x256xf32>
    %45 = vector.shape_cast %44 : vector<1x8x256xf32> to vector<8x256xf32>
    %46 = tpu.concatenate %43, %45 in 1 : vector<8x256xf32>, vector<8x256xf32> -> vector<8x512xf32>
    %c0_29 = arith.constant 0 : index
    %c0_30 = arith.constant 0 : index
    %c2 = arith.constant 2 : index
    %47 = vector.load %arg12[%c0_29, %c0_30, %c2] : memref<2x8x290xf32, #tpu.memory_space<vmem>>, vector<1x8x256xf32>
    %48 = vector.shape_cast %47 : vector<1x8x256xf32> to vector<8x256xf32>
    %c1_31 = arith.constant 1 : index
    %c0_32 = arith.constant 0 : index
    %c2_33 = arith.constant 2 : index
    %49 = vector.load %arg12[%c1_31, %c0_32, %c2_33] : memref<2x8x290xf32, #tpu.memory_space<vmem>>, vector<1x8x256xf32>
    %50 = vector.shape_cast %49 : vector<1x8x256xf32> to vector<8x256xf32>
    %51 = tpu.concatenate %48, %50 in 1 : vector<8x256xf32>, vector<8x256xf32> -> vector<8x512xf32>
    %cst_34 = arith.constant 0.000000e+00 : f32
    %52 = vector.shape_cast %20 : vector<1x512xi1> to vector<1x512xi1>
    %53 = vector.broadcast %52 : vector<1x512xi1> to vector<8x512xi1>
    %54 = vector.broadcast %cst_34 : f32 to vector<8x512xf32>
    %55 = arith.select %53, %51, %54 : vector<8x512xi1>, vector<8x512xf32>
    %c0_35 = arith.constant 0 : index
    %c0_36 = arith.constant 0 : index
    %c16 = arith.constant 16 : index
    %56 = vector.load %arg12[%c0_35, %c0_36, %c16] : memref<2x8x290xf32, #tpu.memory_space<vmem>>, vector<1x8x256xf32>
    %57 = vector.shape_cast %56 : vector<1x8x256xf32> to vector<8x256xf32>
    %c1_37 = arith.constant 1 : index
    %c0_38 = arith.constant 0 : index
    %c16_39 = arith.constant 16 : index
    %58 = vector.load %arg12[%c1_37, %c0_38, %c16_39] : memref<2x8x290xf32, #tpu.memory_space<vmem>>, vector<1x8x256xf32>
    %59 = vector.shape_cast %58 : vector<1x8x256xf32> to vector<8x256xf32>
    %60 = tpu.concatenate %57, %59 in 1 : vector<8x256xf32>, vector<8x256xf32> -> vector<8x512xf32>
    %cst_40 = arith.constant 0.000000e+00 : f32
    %61 = vector.shape_cast %18 : vector<1x512xi1> to vector<1x512xi1>
    %62 = vector.broadcast %61 : vector<1x512xi1> to vector<8x512xi1>
    %63 = vector.broadcast %cst_40 : f32 to vector<8x512xf32>
    %64 = arith.select %62, %60, %63 : vector<8x512xi1>, vector<8x512xf32>
    %c0_41 = arith.constant 0 : index
    %c0_42 = arith.constant 0 : index
    %c17_43 = arith.constant 17 : index
    %65 = vector.load %arg12[%c0_41, %c0_42, %c17_43] : memref<2x8x290xf32, #tpu.memory_space<vmem>>, vector<1x8x256xf32>
    %66 = vector.shape_cast %65 : vector<1x8x256xf32> to vector<8x256xf32>
    %c1_44 = arith.constant 1 : index
    %c0_45 = arith.constant 0 : index
    %c17_46 = arith.constant 17 : index
    %67 = vector.load %arg12[%c1_44, %c0_45, %c17_46] : memref<2x8x290xf32, #tpu.memory_space<vmem>>, vector<1x8x256xf32>
    %68 = vector.shape_cast %67 : vector<1x8x256xf32> to vector<8x256xf32>
    %69 = tpu.concatenate %66, %68 in 1 : vector<8x256xf32>, vector<8x256xf32> -> vector<8x512xf32>
    %c0_47 = arith.constant 0 : index
    %c0_48 = arith.constant 0 : index
    %c18 = arith.constant 18 : index
    %70 = vector.load %arg12[%c0_47, %c0_48, %c18] : memref<2x8x290xf32, #tpu.memory_space<vmem>>, vector<1x8x256xf32>
    %71 = vector.shape_cast %70 : vector<1x8x256xf32> to vector<8x256xf32>
    %c1_49 = arith.constant 1 : index
    %c0_50 = arith.constant 0 : index
    %c18_51 = arith.constant 18 : index
    %72 = vector.load %arg12[%c1_49, %c0_50, %c18_51] : memref<2x8x290xf32, #tpu.memory_space<vmem>>, vector<1x8x256xf32>
    %73 = vector.shape_cast %72 : vector<1x8x256xf32> to vector<8x256xf32>
    %74 = tpu.concatenate %71, %73 in 1 : vector<8x256xf32>, vector<8x256xf32> -> vector<8x512xf32>
    %cst_52 = arith.constant 0.000000e+00 : f32
    %75 = vector.shape_cast %20 : vector<1x512xi1> to vector<1x512xi1>
    %76 = vector.broadcast %75 : vector<1x512xi1> to vector<8x512xi1>
    %77 = vector.broadcast %cst_52 : f32 to vector<8x512xf32>
    %78 = arith.select %76, %74, %77 : vector<8x512xi1>, vector<8x512xf32>
    %c0_53 = arith.constant 0 : index
    %c0_54 = arith.constant 0 : index
    %c32 = arith.constant 32 : index
    %79 = vector.load %arg12[%c0_53, %c0_54, %c32] : memref<2x8x290xf32, #tpu.memory_space<vmem>>, vector<1x8x256xf32>
    %80 = vector.shape_cast %79 : vector<1x8x256xf32> to vector<8x256xf32>
    %c1_55 = arith.constant 1 : index
    %c0_56 = arith.constant 0 : index
    %c32_57 = arith.constant 32 : index
    %81 = vector.load %arg12[%c1_55, %c0_56, %c32_57] : memref<2x8x290xf32, #tpu.memory_space<vmem>>, vector<1x8x256xf32>
    %82 = vector.shape_cast %81 : vector<1x8x256xf32> to vector<8x256xf32>
    %83 = tpu.concatenate %80, %82 in 1 : vector<8x256xf32>, vector<8x256xf32> -> vector<8x512xf32>
    %cst_58 = arith.constant 0.000000e+00 : f32
    %84 = vector.shape_cast %18 : vector<1x512xi1> to vector<1x512xi1>
    %85 = vector.broadcast %84 : vector<1x512xi1> to vector<8x512xi1>
    %86 = vector.broadcast %cst_58 : f32 to vector<8x512xf32>
    %87 = arith.select %85, %83, %86 : vector<8x512xi1>, vector<8x512xf32>
    %c0_59 = arith.constant 0 : index
    %c0_60 = arith.constant 0 : index
    %c33 = arith.constant 33 : index
    %88 = vector.load %arg12[%c0_59, %c0_60, %c33] : memref<2x8x290xf32, #tpu.memory_space<vmem>>, vector<1x8x256xf32>
    %89 = vector.shape_cast %88 : vector<1x8x256xf32> to vector<8x256xf32>
    %c1_61 = arith.constant 1 : index
    %c0_62 = arith.constant 0 : index
    %c33_63 = arith.constant 33 : index
    %90 = vector.load %arg12[%c1_61, %c0_62, %c33_63] : memref<2x8x290xf32, #tpu.memory_space<vmem>>, vector<1x8x256xf32>
    %91 = vector.shape_cast %90 : vector<1x8x256xf32> to vector<8x256xf32>
    %92 = tpu.concatenate %89, %91 in 1 : vector<8x256xf32>, vector<8x256xf32> -> vector<8x512xf32>
    %c0_64 = arith.constant 0 : index
    %c0_65 = arith.constant 0 : index
    %c34 = arith.constant 34 : index
    %93 = vector.load %arg12[%c0_64, %c0_65, %c34] : memref<2x8x290xf32, #tpu.memory_space<vmem>>, vector<1x8x256xf32>
    %94 = vector.shape_cast %93 : vector<1x8x256xf32> to vector<8x256xf32>
    %c1_66 = arith.constant 1 : index
    %c0_67 = arith.constant 0 : index
    %c34_68 = arith.constant 34 : index
    %95 = vector.load %arg12[%c1_66, %c0_67, %c34_68] : memref<2x8x290xf32, #tpu.memory_space<vmem>>, vector<1x8x256xf32>
    %96 = vector.shape_cast %95 : vector<1x8x256xf32> to vector<8x256xf32>
    %97 = tpu.concatenate %94, %96 in 1 : vector<8x256xf32>, vector<8x256xf32> -> vector<8x512xf32>
    %cst_69 = arith.constant 0.000000e+00 : f32
    %98 = vector.shape_cast %20 : vector<1x512xi1> to vector<1x512xi1>
    %99 = vector.broadcast %98 : vector<1x512xi1> to vector<8x512xi1>
    %100 = vector.broadcast %cst_69 : f32 to vector<8x512xf32>
    %101 = arith.select %99, %97, %100 : vector<8x512xi1>, vector<8x512xf32>
    %102 = tpu.concatenate %41, %46, %55, %64, %69, %78, %87, %92, %101 in 0 : vector<8x512xf32>, vector<8x512xf32>, vector<8x512xf32>, vector<8x512xf32>, vector<8x512xf32>, vector<8x512xf32>, vector<8x512xf32>, vector<8x512xf32>, vector<8x512xf32> -> vector<72x512xf32>
    %c0_70 = arith.constant 0 : index
    %c0_71 = arith.constant 0 : index
    %103 = vector.load %arg2[%c0_70, %c0_71] : memref<8x72xf32, #tpu.memory_space<vmem>>, vector<8x72xf32>
    %cst_72 = arith.constant dense<0.000000e+00> : vector<8x512xf32>
    %104 = tpu.matmul %103, %102, %cst_72 {dimension_numbers = #tpu.dot_dimension_numbers<[1], [0], [0], [1], [0, 0, 1, 1], [], []>} : vector<8x72xf32>, vector<72x512xf32>, vector<8x512xf32> -> vector<8x512xf32>
    %c0_73 = arith.constant 0 : index
    %c0_74 = arith.constant 0 : index
    %105 = vector.load %arg3[%c0_73, %c0_74] : memref<8x1xf32, #tpu.memory_space<vmem>>, vector<8x1xf32>
    %106 = vector.broadcast %105 : vector<8x1xf32> to vector<8x512xf32>
    %107 = arith.mulf %104, %106 : vector<8x512xf32>
    %c0_75 = arith.constant 0 : index
    %c0_76 = arith.constant 0 : index
    %108 = vector.load %arg4[%c0_75, %c0_76] : memref<8x1xf32, #tpu.memory_space<vmem>>, vector<8x1xf32>
    %109 = vector.broadcast %108 : vector<8x1xf32> to vector<8x512xf32>
    %110 = arith.addf %107, %109 : vector<8x512xf32>
    %cst_77 = arith.constant 3.000000e+00 : f32
    %111 = vector.broadcast %cst_77 : f32 to vector<8x512xf32>
    %112 = arith.addf %110, %111 : vector<8x512xf32>
    %cst_78 = arith.constant 0.000000e+00 : f32
    %cst_79 = arith.constant 6.000000e+00 : f32
    %113 = vector.broadcast %cst_78 : f32 to vector<8x512xf32>
    %114 = arith.maximumf %113, %112 : vector<8x512xf32>
    %115 = vector.broadcast %cst_79 : f32 to vector<8x512xf32>
    %116 = arith.minimumf %115, %114 : vector<8x512xf32>
    %117 = arith.mulf %110, %116 : vector<8x512xf32>
    %cst_80 = arith.constant 0.166666672 : f32
    %118 = vector.broadcast %cst_80 : f32 to vector<8x512xf32>
    %119 = arith.mulf %117, %118 : vector<8x512xf32>
    %cst_81 = arith.constant 0.000000e+00 : f32
    %120 = vector.broadcast %cst_81 : f32 to vector<2x8x290xf32>
    %c0_82 = arith.constant 0 : index
    %c0_83 = arith.constant 0 : index
    %c0_84 = arith.constant 0 : index
    %121 = vector.load %arg13[%c0_82, %c0_83, %c0_84] : memref<2x8x290xf32, #tpu.memory_space<vmem>>, vector<2x8x290xf32>
    tpu.vector_store %arg13[%c0_82, %c0_83, %c0_84], %120 {strides = array<i32>} : memref<2x8x290xf32, #tpu.memory_space<vmem>>, vector<2x8x290xf32>,
    %122 = vector.extract_strided_slice %119 {offsets = [0, 0], sizes = [8, 256], strides = [1, 1]} : vector<8x512xf32> to vector<8x256xf32>
    %c0_85 = arith.constant 0 : index
    %c0_86 = arith.constant 0 : index
    %c17_87 = arith.constant 17 : index
    %123 = vector.load %arg13[%c0_85, %c0_86, %c17_87] : memref<2x8x290xf32, #tpu.memory_space<vmem>>, vector<1x8x256xf32>
    %124 = vector.shape_cast %123 : vector<1x8x256xf32> to vector<8x256xf32>
    %125 = vector.shape_cast %122 : vector<8x256xf32> to vector<1x8x256xf32>
    tpu.vector_store %arg13[%c0_85, %c0_86, %c17_87], %125 {strides = array<i32>} : memref<2x8x290xf32, #tpu.memory_space<vmem>>, vector<1x8x256xf32>,
    %126 = vector.extract_strided_slice %119 {offsets = [0, 256], sizes = [8, 256], strides = [1, 1]} : vector<8x512xf32> to vector<8x256xf32>
    %c1_88 = arith.constant 1 : index
    %c0_89 = arith.constant 0 : index
    %c17_90 = arith.constant 17 : index
    %127 = vector.load %arg13[%c1_88, %c0_89, %c17_90] : memref<2x8x290xf32, #tpu.memory_space<vmem>>, vector<1x8x256xf32>
    %128 = vector.shape_cast %127 : vector<1x8x256xf32> to vector<8x256xf32>
    %129 = vector.shape_cast %126 : vector<8x256xf32> to vector<1x8x256xf32>
    tpu.vector_store %arg13[%c1_88, %c0_89, %c17_90], %129 {strides = array<i32>} : memref<2x8x290xf32, #tpu.memory_space<vmem>>, vector<1x8x256xf32>,
    %c0_91 = arith.constant 0 : index
    %c0_92 = arith.constant 0 : index
    %c0_93 = arith.constant 0 : index
    %130 = vector.load %arg13[%c0_91, %c0_92, %c0_93] : memref<2x8x290xf32, #tpu.memory_space<vmem>>, vector<1x8x256xf32>
    %131 = vector.shape_cast %130 : vector<1x8x256xf32> to vector<8x256xf32>
    %c1_94 = arith.constant 1 : index
    %c0_95 = arith.constant 0 : index
    %c0_96 = arith.constant 0 : index
    %132 = vector.load %arg13[%c1_94, %c0_95, %c0_96] : memref<2x8x290xf32, #tpu.memory_space<vmem>>, vector<1x8x256xf32>
    %133 = vector.shape_cast %132 : vector<1x8x256xf32> to vector<8x256xf32>
    %134 = tpu.concatenate %131, %133 in 1 : vector<8x256xf32>, vector<8x256xf32> -> vector<8x512xf32>
    %cst_97 = arith.constant 0.000000e+00 : f32
    %135 = vector.shape_cast %18 : vector<1x512xi1> to vector<1x512xi1>
    %136 = vector.broadcast %135 : vector<1x512xi1> to vector<8x512xi1>
    %137 = vector.broadcast %cst_97 : f32 to vector<8x512xf32>
    %138 = arith.select %136, %134, %137 : vector<8x512xi1>, vector<8x512xf32>
    %c0_98 = arith.constant 0 : index
    %c0_99 = arith.constant 0 : index
    %c1_100 = arith.constant 1 : index
    %139 = vector.load %arg13[%c0_98, %c0_99, %c1_100] : memref<2x8x290xf32, #tpu.memory_space<vmem>>, vector<1x8x256xf32>
    %140 = vector.shape_cast %139 : vector<1x8x256xf32> to vector<8x256xf32>
    %c1_101 = arith.constant 1 : index
    %c0_102 = arith.constant 0 : index
    %c1_103 = arith.constant 1 : index
    %141 = vector.load %arg13[%c1_101, %c0_102, %c1_103] : memref<2x8x290xf32, #tpu.memory_space<vmem>>, vector<1x8x256xf32>
    %142 = vector.shape_cast %141 : vector<1x8x256xf32> to vector<8x256xf32>
    %143 = tpu.concatenate %140, %142 in 1 : vector<8x256xf32>, vector<8x256xf32> -> vector<8x512xf32>
    %c0_104 = arith.constant 0 : index
    %c0_105 = arith.constant 0 : index
    %c2_106 = arith.constant 2 : index
    %144 = vector.load %arg13[%c0_104, %c0_105, %c2_106] : memref<2x8x290xf32, #tpu.memory_space<vmem>>, vector<1x8x256xf32>
    %145 = vector.shape_cast %144 : vector<1x8x256xf32> to vector<8x256xf32>
    %c1_107 = arith.constant 1 : index
    %c0_108 = arith.constant 0 : index
    %c2_109 = arith.constant 2 : index
    %146 = vector.load %arg13[%c1_107, %c0_108, %c2_109] : memref<2x8x290xf32, #tpu.memory_space<vmem>>, vector<1x8x256xf32>
    %147 = vector.shape_cast %146 : vector<1x8x256xf32> to vector<8x256xf32>
    %148 = tpu.concatenate %145, %147 in 1 : vector<8x256xf32>, vector<8x256xf32> -> vector<8x512xf32>
    %cst_110 = arith.constant 0.000000e+00 : f32
    %149 = vector.shape_cast %20 : vector<1x512xi1> to vector<1x512xi1>
    %150 = vector.broadcast %149 : vector<1x512xi1> to vector<8x512xi1>
    %151 = vector.broadcast %cst_110 : f32 to vector<8x512xf32>
    %152 = arith.select %150, %148, %151 : vector<8x512xi1>, vector<8x512xf32>
    %c0_111 = arith.constant 0 : index
    %c0_112 = arith.constant 0 : index
    %c16_113 = arith.constant 16 : index
    %153 = vector.load %arg13[%c0_111, %c0_112, %c16_113] : memref<2x8x290xf32, #tpu.memory_space<vmem>>, vector<1x8x256xf32>
    %154 = vector.shape_cast %153 : vector<1x8x256xf32> to vector<8x256xf32>
    %c1_114 = arith.constant 1 : index
    %c0_115 = arith.constant 0 : index
    %c16_116 = arith.constant 16 : index
    %155 = vector.load %arg13[%c1_114, %c0_115, %c16_116] : memref<2x8x290xf32, #tpu.memory_space<vmem>>, vector<1x8x256xf32>
    %156 = vector.shape_cast %155 : vector<1x8x256xf32> to vector<8x256xf32>
    %157 = tpu.concatenate %154, %156 in 1 : vector<8x256xf32>, vector<8x256xf32> -> vector<8x512xf32>
    %cst_117 = arith.constant 0.000000e+00 : f32
    %158 = vector.shape_cast %18 : vector<1x512xi1> to vector<1x512xi1>
    %159 = vector.broadcast %158 : vector<1x512xi1> to vector<8x512xi1>
    %160 = vector.broadcast %cst_117 : f32 to vector<8x512xf32>
    %161 = arith.select %159, %157, %160 : vector<8x512xi1>, vector<8x512xf32>
    %c0_118 = arith.constant 0 : index
    %c0_119 = arith.constant 0 : index
    %c17_120 = arith.constant 17 : index
    %162 = vector.load %arg13[%c0_118, %c0_119, %c17_120] : memref<2x8x290xf32, #tpu.memory_space<vmem>>, vector<1x8x256xf32>
    %163 = vector.shape_cast %162 : vector<1x8x256xf32> to vector<8x256xf32>
    %c1_121 = arith.constant 1 : index
    %c0_122 = arith.constant 0 : index
    %c17_123 = arith.constant 17 : index
    %164 = vector.load %arg13[%c1_121, %c0_122, %c17_123] : memref<2x8x290xf32, #tpu.memory_space<vmem>>, vector<1x8x256xf32>
    %165 = vector.shape_cast %164 : vector<1x8x256xf32> to vector<8x256xf32>
    %166 = tpu.concatenate %163, %165 in 1 : vector<8x256xf32>, vector<8x256xf32> -> vector<8x512xf32>
    %c0_124 = arith.constant 0 : index
    %c0_125 = arith.constant 0 : index
    %c18_126 = arith.constant 18 : index
    %167 = vector.load %arg13[%c0_124, %c0_125, %c18_126] : memref<2x8x290xf32, #tpu.memory_space<vmem>>, vector<1x8x256xf32>
    %168 = vector.shape_cast %167 : vector<1x8x256xf32> to vector<8x256xf32>
    %c1_127 = arith.constant 1 : index
    %c0_128 = arith.constant 0 : index
    %c18_129 = arith.constant 18 : index
    %169 = vector.load %arg13[%c1_127, %c0_128, %c18_129] : memref<2x8x290xf32, #tpu.memory_space<vmem>>, vector<1x8x256xf32>
    %170 = vector.shape_cast %169 : vector<1x8x256xf32> to vector<8x256xf32>
    %171 = tpu.concatenate %168, %170 in 1 : vector<8x256xf32>, vector<8x256xf32> -> vector<8x512xf32>
    %cst_130 = arith.constant 0.000000e+00 : f32
    %172 = vector.shape_cast %20 : vector<1x512xi1> to vector<1x512xi1>
    %173 = vector.broadcast %172 : vector<1x512xi1> to vector<8x512xi1>
    %174 = vector.broadcast %cst_130 : f32 to vector<8x512xf32>
    %175 = arith.select %173, %171, %174 : vector<8x512xi1>, vector<8x512xf32>
    %c0_131 = arith.constant 0 : index
    %c0_132 = arith.constant 0 : index
    %c32_133 = arith.constant 32 : index
    %176 = vector.load %arg13[%c0_131, %c0_132, %c32_133] : memref<2x8x290xf32, #tpu.memory_space<vmem>>, vector<1x8x256xf32>
    %177 = vector.shape_cast %176 : vector<1x8x256xf32> to vector<8x256xf32>
    %c1_134 = arith.constant 1 : index
    %c0_135 = arith.constant 0 : index
    %c32_136 = arith.constant 32 : index
    %178 = vector.load %arg13[%c1_134, %c0_135, %c32_136] : memref<2x8x290xf32, #tpu.memory_space<vmem>>, vector<1x8x256xf32>
    %179 = vector.shape_cast %178 : vector<1x8x256xf32> to vector<8x256xf32>
    %180 = tpu.concatenate %177, %179 in 1 : vector<8x256xf32>, vector<8x256xf32> -> vector<8x512xf32>
    %cst_137 = arith.constant 0.000000e+00 : f32
    %181 = vector.shape_cast %18 : vector<1x512xi1> to vector<1x512xi1>
    %182 = vector.broadcast %181 : vector<1x512xi1> to vector<8x512xi1>
    %183 = vector.broadcast %cst_137 : f32 to vector<8x512xf32>
    %184 = arith.select %182, %180, %183 : vector<8x512xi1>, vector<8x512xf32>
    %c0_138 = arith.constant 0 : index
    %c0_139 = arith.constant 0 : index
    %c33_140 = arith.constant 33 : index
    %185 = vector.load %arg13[%c0_138, %c0_139, %c33_140] : memref<2x8x290xf32, #tpu.memory_space<vmem>>, vector<1x8x256xf32>
    %186 = vector.shape_cast %185 : vector<1x8x256xf32> to vector<8x256xf32>
    %c1_141 = arith.constant 1 : index
    %c0_142 = arith.constant 0 : index
    %c33_143 = arith.constant 33 : index
    %187 = vector.load %arg13[%c1_141, %c0_142, %c33_143] : memref<2x8x290xf32, #tpu.memory_space<vmem>>, vector<1x8x256xf32>
    %188 = vector.shape_cast %187 : vector<1x8x256xf32> to vector<8x256xf32>
    %189 = tpu.concatenate %186, %188 in 1 : vector<8x256xf32>, vector<8x256xf32> -> vector<8x512xf32>
    %c0_144 = arith.constant 0 : index
    %c0_145 = arith.constant 0 : index
    %c34_146 = arith.constant 34 : index
    %190 = vector.load %arg13[%c0_144, %c0_145, %c34_146] : memref<2x8x290xf32, #tpu.memory_space<vmem>>, vector<1x8x256xf32>
    %191 = vector.shape_cast %190 : vector<1x8x256xf32> to vector<8x256xf32>
    %c1_147 = arith.constant 1 : index
    %c0_148 = arith.constant 0 : index
    %c34_149 = arith.constant 34 : index
    %192 = vector.load %arg13[%c1_147, %c0_148, %c34_149] : memref<2x8x290xf32, #tpu.memory_space<vmem>>, vector<1x8x256xf32>
    %193 = vector.shape_cast %192 : vector<1x8x256xf32> to vector<8x256xf32>
    %194 = tpu.concatenate %191, %193 in 1 : vector<8x256xf32>, vector<8x256xf32> -> vector<8x512xf32>
    %cst_150 = arith.constant 0.000000e+00 : f32
    %195 = vector.shape_cast %20 : vector<1x512xi1> to vector<1x512xi1>
    %196 = vector.broadcast %195 : vector<1x512xi1> to vector<8x512xi1>
    %197 = vector.broadcast %cst_150 : f32 to vector<8x512xf32>
    %198 = arith.select %196, %194, %197 : vector<8x512xi1>, vector<8x512xf32>
    %199 = tpu.concatenate %138, %143, %152, %161, %166, %175, %184, %189, %198 in 0 : vector<8x512xf32>, vector<8x512xf32>, vector<8x512xf32>, vector<8x512xf32>, vector<8x512xf32>, vector<8x512xf32>, vector<8x512xf32>, vector<8x512xf32>, vector<8x512xf32> -> vector<72x512xf32>
    %c0_151 = arith.constant 0 : index
    %c0_152 = arith.constant 0 : index
    %200 = vector.load %arg5[%c0_151, %c0_152] : memref<8x72xf32, #tpu.memory_space<vmem>>, vector<8x72xf32>
    %cst_153 = arith.constant dense<0.000000e+00> : vector<8x512xf32>
    %201 = tpu.matmul %200, %199, %cst_153 {dimension_numbers = #tpu.dot_dimension_numbers<[1], [0], [0], [1], [0, 0, 1, 1], [], []>} : vector<8x72xf32>, vector<72x512xf32>, vector<8x512xf32> -> vector<8x512xf32>
    %c0_154 = arith.constant 0 : index
    %c0_155 = arith.constant 0 : index
    %202 = vector.load %arg6[%c0_154, %c0_155] : memref<8x1xf32, #tpu.memory_space<vmem>>, vector<8x1xf32>
    %203 = vector.broadcast %202 : vector<8x1xf32> to vector<8x512xf32>
    %204 = arith.mulf %201, %203 : vector<8x512xf32>
    %c0_156 = arith.constant 0 : index
    %c0_157 = arith.constant 0 : index
    %205 = vector.load %arg7[%c0_156, %c0_157] : memref<8x1xf32, #tpu.memory_space<vmem>>, vector<8x1xf32>
    %206 = vector.broadcast %205 : vector<8x1xf32> to vector<8x512xf32>
    %207 = arith.addf %204, %206 : vector<8x512xf32>
    %cst_158 = arith.constant 3.000000e+00 : f32
    %208 = vector.broadcast %cst_158 : f32 to vector<8x512xf32>
    %209 = arith.addf %207, %208 : vector<8x512xf32>
    %cst_159 = arith.constant 0.000000e+00 : f32
    %cst_160 = arith.constant 6.000000e+00 : f32
    %210 = vector.broadcast %cst_159 : f32 to vector<8x512xf32>
    %211 = arith.maximumf %210, %209 : vector<8x512xf32>
    %212 = vector.broadcast %cst_160 : f32 to vector<8x512xf32>
    %213 = arith.minimumf %212, %211 : vector<8x512xf32>
    %214 = arith.mulf %207, %213 : vector<8x512xf32>
    %cst_161 = arith.constant 0.166666672 : f32
    %215 = vector.broadcast %cst_161 : f32 to vector<8x512xf32>
    %216 = arith.mulf %214, %215 : vector<8x512xf32>
    %c0_162 = arith.constant 0 : index
    %c0_163 = arith.constant 0 : index
    %217 = vector.load %arg8[%c0_162, %c0_163] : memref<8x8xf32, #tpu.memory_space<vmem>>, vector<8x8xf32>
    %cst_164 = arith.constant dense<0.000000e+00> : vector<8x512xf32>
    %218 = tpu.matmul %217, %119, %cst_164 {dimension_numbers = #tpu.dot_dimension_numbers<[1], [0], [0], [1], [0, 0, 1, 1], [], []>} : vector<8x8xf32>, vector<8x512xf32>, vector<8x512xf32> -> vector<8x512xf32>
    %c0_165 = arith.constant 0 : index
    %c0_166 = arith.constant 0 : index
    %219 = vector.load %arg9[%c0_165, %c0_166] : memref<8x1xf32, #tpu.memory_space<vmem>>, vector<8x1xf32>
    %220 = vector.broadcast %219 : vector<8x1xf32> to vector<8x512xf32>
    %221 = arith.mulf %218, %220 : vector<8x512xf32>
    %c0_167 = arith.constant 0 : index
    %c0_168 = arith.constant 0 : index
    %222 = vector.load %arg10[%c0_167, %c0_168] : memref<8x1xf32, #tpu.memory_space<vmem>>, vector<8x1xf32>
    %223 = vector.broadcast %222 : vector<8x1xf32> to vector<8x512xf32>
    %224 = arith.addf %221, %223 : vector<8x512xf32>
    %cst_169 = arith.constant 3.000000e+00 : f32
    %225 = vector.broadcast %cst_169 : f32 to vector<8x512xf32>
    %226 = arith.addf %224, %225 : vector<8x512xf32>
    %cst_170 = arith.constant 0.000000e+00 : f32
    %cst_171 = arith.constant 6.000000e+00 : f32
    %227 = vector.broadcast %cst_170 : f32 to vector<8x512xf32>
    %228 = arith.maximumf %227, %226 : vector<8x512xf32>
    %229 = vector.broadcast %cst_171 : f32 to vector<8x512xf32>
    %230 = arith.minimumf %229, %228 : vector<8x512xf32>
    %231 = arith.mulf %224, %230 : vector<8x512xf32>
    %cst_172 = arith.constant 0.166666672 : f32
    %232 = vector.broadcast %cst_172 : f32 to vector<8x512xf32>
    %233 = arith.mulf %231, %232 : vector<8x512xf32>
    %234 = arith.addf %216, %233 : vector<8x512xf32>
    %cst_173 = arith.constant 0.000000e+00 : f32
    %235 = vector.broadcast %cst_173 : f32 to vector<8x512xf32>
    %236 = arith.maximumf %234, %235 : vector<8x512xf32>
    %237 = vector.extract_strided_slice %236 {offsets = [0, 0], sizes = [8, 256], strides = [1, 1]} : vector<8x512xf32> to vector<8x256xf32>
    %238 = arith.addf %22, %237 : vector<8x256xf32>
    %c0_174 = arith.constant 0 : index
    %c0_175 = arith.constant 0 : index
    %c0_176 = arith.constant 0 : index
    %239 = vector.load %arg11[%c0_174, %c0_175, %c0_176] : memref<2x8x256xf32, #tpu.memory_space<vmem>>, vector<1x8x256xf32>
    %240 = vector.shape_cast %239 : vector<1x8x256xf32> to vector<8x256xf32>
    %241 = vector.shape_cast %238 : vector<8x256xf32> to vector<1x8x256xf32>
    tpu.vector_store %arg11[%c0_174, %c0_175, %c0_176], %241 {strides = array<i32>} : memref<2x8x256xf32, #tpu.memory_space<vmem>>, vector<1x8x256xf32>,
    %242 = vector.extract_strided_slice %236 {offsets = [0, 256], sizes = [8, 256], strides = [1, 1]} : vector<8x512xf32> to vector<8x256xf32>
    %243 = arith.addf %24, %242 : vector<8x256xf32>
    %c1_177 = arith.constant 1 : index
    %c0_178 = arith.constant 0 : index
    %c0_179 = arith.constant 0 : index
    %244 = vector.load %arg11[%c1_177, %c0_178, %c0_179] : memref<2x8x256xf32, #tpu.memory_space<vmem>>, vector<1x8x256xf32>
    %245 = vector.shape_cast %244 : vector<1x8x256xf32> to vector<8x256xf32>
    %246 = vector.shape_cast %243 : vector<8x256xf32> to vector<1x8x256xf32>
    tpu.vector_store %arg11[%c1_177, %c0_178, %c0_179], %246 {strides = array<i32>} : memref<2x8x256xf32, #tpu.memory_space<vmem>>, vector<1x8x256xf32>,
    return
  }
  func.func @transform_0(%arg0: i32) -> (i32, i32, i32) {
    %c0_i32 = arith.constant 0 : i32
    %c0_i32_0 = arith.constant 0 : i32
    %c0_i32_1 = arith.constant 0 : i32
    return %arg0, %c0_i32, %c0_i32_0 : i32, i32, i32
  }
  func.func @transform_1(%arg0: i32) -> (i32, i32) {
    %c0_i32 = arith.constant 0 : i32
    %c0_i32_0 = arith.constant 0 : i32
    %c0_i32_1 = arith.constant 0 : i32
    return %c0_i32, %c0_i32_0 : i32, i32
  }
  func.func @transform_2(%arg0: i32) -> (i32, i32) {
    %c0_i32 = arith.constant 0 : i32
    %c0_i32_0 = arith.constant 0 : i32
    %c0_i32_1 = arith.constant 0 : i32
    return %c0_i32, %c0_i32_0 : i32, i32
  }
  func.func @transform_3(%arg0: i32) -> (i32, i32) {
    %c0_i32 = arith.constant 0 : i32
    %c0_i32_0 = arith.constant 0 : i32
    %c0_i32_1 = arith.constant 0 : i32
    return %c0_i32, %c0_i32_0 : i32, i32
  }
  func.func @transform_4(%arg0: i32) -> (i32, i32) {
    %c0_i32 = arith.constant 0 : i32
    %c0_i32_0 = arith.constant 0 : i32
    %c0_i32_1 = arith.constant 0 : i32
    return %c0_i32, %c0_i32_0 : i32, i32
  }
  func.func @transform_5(%arg0: i32) -> (i32, i32) {
    %c0_i32 = arith.constant 0 : i32
    %c0_i32_0 = arith.constant 0 : i32
    %c0_i32_1 = arith.constant 0 : i32
    return %c0_i32, %c0_i32_0 : i32, i32
  }
  func.func @transform_6(%arg0: i32) -> (i32, i32) {
    %c0_i32 = arith.constant 0 : i32
    %c0_i32_0 = arith.constant 0 : i32
    %c0_i32_1 = arith.constant 0 : i32
    return %c0_i32, %c0_i32_0 : i32, i32
  }
  func.func @transform_7(%arg0: i32) -> (i32, i32) {
    %c0_i32 = arith.constant 0 : i32
    %c0_i32_0 = arith.constant 0 : i32
    %c0_i32_1 = arith.constant 0 : i32
    return %c0_i32, %c0_i32_0 : i32, i32
  }
  func.func @transform_8(%arg0: i32) -> (i32, i32) {
    %c0_i32 = arith.constant 0 : i32
    %c0_i32_0 = arith.constant 0 : i32
    %c0_i32_1 = arith.constant 0 : i32
    return %c0_i32, %c0_i32_0 : i32, i32
  }
  func.func @transform_9(%arg0: i32) -> (i32, i32) {
    %c0_i32 = arith.constant 0 : i32
    %c0_i32_0 = arith.constant 0 : i32
    %c0_i32_1 = arith.constant 0 : i32
    return %c0_i32, %c0_i32_0 : i32, i32
  }
  func.func @transform_10(%arg0: i32) -> (i32, i32, i32) {
    %c0_i32 = arith.constant 0 : i32
    %c0_i32_0 = arith.constant 0 : i32
    %c0_i32_1 = arith.constant 0 : i32
    return %arg0, %c0_i32, %c0_i32_0 : i32, i32, i32
  }
}

</mosaic_0001>

<bundles_post_ra>
// kernel: tpu_custom_call.1
= control target key start
LH: loop header
LB: loop body
LE: loop exit
PB: predicated region body
PF: predicated region fallthrough
CT: control target
= control target key end

     0   :  { %15 = vsyncpa [#allocation5], 0  ;;  %s2449_s0 = inlined_call_operand.hbm [shape: f32[4,8,256], index: 0, kind: input, shape index: {}]   ;;  %s2450_s1 = inlined_call_operand.vmem [shape: f32[8,72], index: 1, kind: input, shape index: {}]   ;;  %s2451_s2 = inlined_call_operand.vmem [shape: f32[8,1], index: 2, kind: input, shape index: {}]   ;;  %s2452_s3 = inlined_call_operand.vmem [shape: f32[8,1], index: 3, kind: input, shape index: {}]   ;;  %s2453_s4 = inlined_call_operand.vmem [shape: f32[8,72], index: 4, kind: input, shape index: {}]   ;;  %s2454_s5 = inlined_call_operand.vmem [shape: f32[8,1], index: 5, kind: input, shape index: {}]   ;;  %s2455_s6 = inlined_call_operand.vmem [shape: f32[8,1], index: 6, kind: input, shape index: {}]   ;;  %s2456_s7 = inlined_call_operand.vmem [shape: f32[8,8], index: 7, kind: input, shape index: {}]   ;;  %s2457_s8 = inlined_call_operand.vmem [shape: f32[8,1], index: 8, kind: input, shape index: {}]   ;;  %s2458_s9 = inlined_call_operand.vmem [shape: f32[8,1], index: 9, kind: input, shape index: {}]   ;;  %s2459_s10 = inlined_call_operand.hbm [shape: f32[4,8,256], index: 10, kind: output, shape index: {}]  }
   0x1   :  { %17 = vsyncpa [#allocation5 + $0x1], 0 }
   0x2   :  { %18 = vsyncpa [#allocation6], 0 }
   0x3   :  { %20 = vsyncpa [#allocation6 + $0x1], 0  ;;  %s1820_s13 = smov 0   ;;  %s1822_s14 = smov 0  }
   0x4   :  { %s1824_s15 = smov 0   ;;  %s1826_s16 = smov 0  }
   0x5 LB: > { %2471 = sst [smem:[#allocation10_spill]] %s1744_s15  ;;  %s1841_s17 = sadd.s32 4294967295, %s1748_s16   ;;  %s1748_s16 = sphi %s1826_s16, %s2519_s16   ;;  %s1744_s15 = sphi %s1824_s15, %s2521_s15   ;;  %s1740_s14 = sphi %s1822_s14, %s2523_s14   ;;  %s1736_s13 = sphi %s1820_s13, %s2522_s13  }
   0x6   : > { %s1415_s18 = sadd.s32 4294967294, %s1748_s16   ;;  %s1845_s19 = sadd.s32 1, %s1748_s16  }
   0x7   : > { %2472 = sst [smem:[#allocation11_spill]] %s1845_s19  ;;  %s33_s20 = sadd.s32 1, %s1744_s15 }
   0x8   : > { %s30_s21 = ssub.s32 %s1748_s16, %s1845_s19  ;;  %p40_p0 = scmp.ne.s32.totalorder %s1744_s15, %s1740_s14 }
   0x9   : > { %p31_p1 = scmp.eq.s32.totalorder %s30_s21, 0  ;;  %p41_p2 = scmp.eq.s32.totalorder %s1748_s16, 0 }
   0xa   : > { %p46_p3 = scmp.ne.s32.totalorder %s1740_s14, %s1736_s13  ;;  %p47_p4 = scmp.eq.s32.totalorder %s1841_s17, 0 }
   0xb   : > { %s1857_s22 = scalar_select %p31_p1, %s1744_s15, %s33_s20  }
   0xc   : > { %p1859_p5 = por %p41_p2, %p40_p0  ;;  %p1863_p6 = por %p47_p4, %p46_p3 }
   0xd   : > { %2473 = sst [smem:[#allocation12_spill]] %s1857_s22  ;;  %p259_p7 = scmp.eq.s32.totalorder %s1841_s17, 1 }
   0xe   : > { %p265_p8 = scmp.eq.s32.totalorder %s1415_s18, 1  ;;  %p1511_p10 = scmp.lt.s32.totalorder %s1748_s16, 2 }
   0xf   : > { %p1870_p11 = por %p259_p7, %p40_p0  ;;  %s312_s27 = sand.u32 1, %s1744_s15  }
  0x10   : > { %p1874_p12 = por %p265_p8, %p46_p3  ;;  %s1496_s28 = sshll.u32 %s1748_s16, 5 }
  0x11   : > { %s1418_s29 = sshll.u32 %s312_s27, 5  ;;  %s322_s12 = scalar_lea.hbm %s2449_s0, %s1496_s28 }
  0x12   : > { %s2477_s26 = scalar_select %p1874_p12, 1, 0 }
  0x13   : > { %s323_s20 = sshll.u32 %s322_s12, 4  ;;  %s316_s18 = scalar_lea.vmem [#allocation4], %s1418_s29  ;;  %s324_s20 = int_to_ptr.hbm [resolvable:$true] %s323_s20 }
  0x14   : > { %2478 = sst [smem:[#allocation13_spill]] %s2477_s26  ;;  %s325_s21 = sshll.u32 %s316_s18, 4  ;;  %s326_s21 = int_to_ptr.vmem [resolvable:$true] %s325_s21 }
  0x15   : > { %p1885_p13 = pnand %p1511_p10, %p1859_p5  ;;  %p1422_p0 = scmp.ge.s32.totalorder %s1748_s16, 1 }
  0x16   : > { %p333_p1 = scmp.lt.s32.totalorder %s1748_s16, 3  ;;  %s313_s15 = scalar_lea.sflag [#allocation5], %s312_s27 }
  0x17   : > { %s1652_s19 = sshra.s32 %s324_s20, 4  ;;  %p1656_p3 = pneg %p1885_p13  ;;  %s1653_s19 = int_to_ptr.hbm [resolvable:$true] %s1652_s19 }
  0x18   : > { %s1654_s26 = scalar_lea.hbm %s1653_s19, 32  ;;  %s1659_s23 = scalar_lea.hbm %s2449_s0, 64 }
  0x19   : > { %p1655_p2 = scmp.ne.s32.totalorder %s1653_s19, %s1654_s26  ;;  %p1660_p5 = scmp.lt.s32.totalorder %s1653_s19, %s2449_s0 }
  0x1a   : > { %p1661_p8 = scmp.lt.s32.totalorder %s1659_s23, %s1654_s26 }
  0x1b   : > { %p1657_p4 = pnand %p1656_p3, %p1655_p2 }
  0x1c   : > { %p1662_p10 = por %p1661_p8, %p1660_p5 }
  0x1d   : > { %p1658_p7 = pneg %p1657_p4 }
  0x1f   : > { %p1663_p9 = pnand %p1662_p10, %p1658_p7 }
  0x21   : > { %1666 = shalt.err (!%p1663_p9)
}
  0x22   : > { %s1750_s27 = smov 256   ;;  %s1751_s12 = smov 16  }
  0x23   : > { %1506 = dma.hbm_to_vmem [thread:$0]  (!%p1885_p13), %s324_s20, 512, %s326_s21, %s313_s15, %s1750_s27, %s1750_s27, %s1751_s12  }
  0x24   : > { %p334_p2 = pnand %p1422_p0, %p333_p1 }
  0x25   : > { %s1906_s18 = sand.u32 (!%p334_p2), 1, %s1740_s14  }
  0x26   : > { %337 = sbr.rel (%p334_p2) target bundleno = 1027 (0x403), region = 60  ;;  %s2464_s19 = sshll.u32 (!%p334_p2), %s1906_s18, 5 }
  0x27   : > { %s340_s26 = scalar_lea.sflag (!%p334_p2), [#allocation5], %s1906_s18  ;;  %s1912_s28 = scalar_lea.vmem (!%p334_p2), [#allocation4], %s2464_s19 }
  0x2b   : > { %1727 = dma.done.wait (%p1863_p6), %s340_s26, 512  }
  0x2c   : > { %1729 = vsyncadd (%p1863_p6), %s340_s26, 4294966784  ;;  %v1752_v0 = vmov 0.0   ;;  %v1425_v1 = vld [vmem:[%s1912_s28 + $0x10] sm:$0xff]  ;;  %v444_v2 = vld [vmem:[%s1912_s28] sm:$0xff]  ;;  %s1753_s15 = smov 17   ;;  %vm451_vm0 = vcmask 277504   ;;  %v383_v36 = vlaneseq }
  0x2d   : > { %453 = vst [vmem:[#allocation2 + $0x18] sm:$0xff] %v1752_v0  ;;  %473 = vrot.lane.b32.xlu0 %v1425_v1, %s1753_s15  ;;  %458 = vrot.lane.b32.xlu1 %v444_v2, %s1753_s15  ;;  %v1426_v3 = vld [vmem:[%s1912_s28 + $0x18] sm:$0xff]  ;;  %v445_v4 = vld [vmem:[%s1912_s28 + $0x8] sm:$0xff]  ;;  %vm2466_vm1 = vcmask 1047688   ;;  %vm462_vm2 = vcmask 138240   ;;  %s1754_s22 = smov 94  }
  0x2e   : > { %449 = vst [vmem:[#allocation2] sm:$0xff] %v1752_v0  ;;  %s1755_s24 = smov 111   ;;  %s1756_s20 = smov 95   ;;  %v2034_v39 = vand.u32 127, %v383_v36  ;;  %vm2465_vm3 = vcmask 769024   ;;  %vm2467_vm6 = vcmask 777216  }
  0x2f   : > { %830 = vst [vmem:[#allocation3] sm:$0xff] %v1752_v0  ;;  %s1757_s21 = smov 96   ;;  %s1758_s29 = smov 112   ;;  %vm640_vm7 = vcmask 785408   ;;  %vm615_vm10 = vcmask 900096   ;;  %vm594_vm11 = vcmask 908288  }
  0x30   : > { %833 = vst [vmem:[#allocation3 + $0x18] sm:$0xff] %v1752_v0  ;;  %s1759_s23 = smov 110   ;;  %s1760_s30 = smov 126   ;;  %v386_v41 = vadd.s32 256, %v2034_v39  ;;  %v387_v42 = vadd.s32 384, %v2034_v39  ;;  %v2076_v1 = vadd.s32 128, %v2034_v39 }
  0x31   : > { %455 = vst.msk [vmem:[#allocation2 + $0x28] sm:$0xff] %vm451_vm0, %v1752_v0  ;;  %s1761_s11 = smov 127   ;;  %vm569_vm12 = vcmask 916480   ;;  %vm2470_vm14 = vcmask 1031168   ;;  %s1498_s27 = sshll.u32 %s1841_s17, 5 }
  0x32   : > { %452 = vst.msk [vmem:[#allocation2 + $0x10] sm:$0xff] %vm451_vm0, %v1752_v0  ;;  %v406_v45 = vand.u32 15, %v386_v41  ;;  %v413_v46 = vand.u32 15, %v387_v42  ;;  %v790_v41 = vld [vmem:[%s2451_s2] sm:$0xff]  ;;  %s1338_s17 = scalar_lea.hbm %s2459_s10, %s1498_s27  ;;  %s1702_s19 = scalar_lea.hbm %s2459_s10, 64 }
  0x33   : > { %832 = vst.msk [vmem:[#allocation3 + $0x10] sm:$0xff] %vm451_vm0, %v1752_v0 }
  0x34   : > { %835 = vst.msk [vmem:[#allocation3 + $0x28] sm:$0xff] %vm451_vm0, %v1752_v0  ;;  %vm2044_vm4 = vcmp.ne.s32.totalorder %v406_v45, 15  ;;  %vm2048_vm5 = vcmp.ne.s32.totalorder %v413_v46, 15  ;;  %vm2061_vm8 = vcmp.ne.s32.totalorder %v406_v45, 0  ;;  %vm2065_vm9 = vcmp.ne.s32.totalorder %v413_v46, 0 }
  0x35   : > { %475 = vrot.lane.b32.xlu0 %v1426_v3, %s1753_s15  ;;  %460 = vrot.lane.b32.xlu1 %v445_v4, %s1753_s15  ;;  %vm2469_vm0 = vcmask 1039360  }
  0x9f   : > { %v474_v5 = vpop.permute.xlu0 %473  ;;  %v459_v6 = vpop.permute.xlu1 %458 }
  0xa0   : > { %482 = vst.msk [vmem:[#allocation2 + $0x18] sm:$0xff] %vm2466_vm1, %v474_v5 }
  0xa1   : > { %468 = vst.msk [vmem:[#allocation2] sm:$0xff] %vm2466_vm1, %v459_v6 }
  0xa7   : > { %v476_v7 = vpop.permute.xlu0 %475  ;;  %v1928_v8 = vld [vmem:[#allocation2 + $0x18] sm:$0xff]  ;;  %v461_v9 = vpop.permute.xlu1 %460 }
  0xa8   : > { %v1931_v10 = vsel %vm462_vm2, %v474_v5, %v476_v7  ;;  %484 = vst.msk [vmem:[#allocation2 + $0x28] sm:$0xff] %vm462_vm2, %v476_v7  ;;  %691 = vrot.lane.b32.xlu2 %v1928_v8, %s1754_s22  ;;  %v1937_v11 = vsel %vm462_vm2, %v459_v6, %v461_v9  ;;  %v1940_v12 = vld [vmem:[#allocation2] sm:$0xff]  ;;  %v392_v6 = vand.u32 15, %v2034_v39 }
  0xa9   : > { %470 = vst.msk [vmem:[#allocation2 + $0x10] sm:$0xff] %vm462_vm2, %v461_v9  ;;  %v1575_v16 = vpack.i.bf16 %v1931_v10, %v1928_v8  ;;  %v1595_v20 = vpack.i.bf16 %v1937_v11, %v1940_v12  ;;  %v800_v39 = vld [vmem:[%s2452_s3] sm:$0xff] }
  0xaa   : > { %vm2090_vm13 = vcmp.ne.s32.totalorder %v392_v6, 15  ;;  %vm2143_vm1 = vcmp.ne.s32.totalorder %v392_v6, 0 }
  0xaf   : > { %v502_v13 = vld [vmem:[#allocation2 + $0x28] sm:$0xff] }
  0xb0   : > { %695 = vrot.lane.b32.xlu0 %v502_v13, %s1754_s22  ;;  %v1565_v14 = vpack.i.bf16 %v1940_v12, %v502_v13  ;;  %v501_v15 = vld [vmem:[#allocation2 + $0x10] sm:$0xff] }
  0xb1   : > { %v1585_v17 = vpack.i.bf16 %v501_v15, %v1937_v11 }
  0xb2   : > { %1566 = vrot.lane.b32.xlu1 %v1565_v14, %s1755_s24  ;;  %1561 = vrot.lane.b32.xlu2 %v1565_v14, %s1756_s20  ;;  %v399_v14 = vand.u32 15, %v2076_v1 }
  0xb4   : > { %vm2098_vm15 = vcmp.ne.s32.totalorder %v399_v14, 15 }
  0xb8   : > { %645 = vrot.lane.b32.xlu0 %v1928_v8, %s1757_s21 }
  0xba   : > { %578 = vrot.lane.b32.xlu1 %v502_v13, %s1758_s29  ;;  %649 = vrot.lane.b32.xlu2 %v502_v13, %s1757_s21 }
  0xc0   : > { %620 = vrot.lane.b32.xlu0 %v1928_v8, %s1759_s23 }
  0xc2   : > { %545 = vrot.lane.b32.xlu1 %v502_v13, %s1760_s30  ;;  %624 = vrot.lane.b32.xlu2 %v502_v13, %s1759_s23 }
  0xc8   : > { %524 = vrot.lane.b32.xlu0 %v502_v13, %s1761_s11 }
  0xca   : > { %574 = vrot.lane.b32.xlu2 %v1928_v8, %s1758_s29  ;;  %684 = vrot.lane.b32.xlu1 %v501_v15, %s1754_s22 }
  0xd0   : > { %563 = vrot.lane.b32.xlu0 %v1940_v12, %s1758_s29 }
  0xd2   : > { %541 = vrot.lane.b32.xlu2 %v1928_v8, %s1760_s30  ;;  %638 = vrot.lane.b32.xlu1 %v501_v15, %s1757_s21 }
  0xd8   : > { %530 = vrot.lane.b32.xlu0 %v1940_v12, %s1760_s30 }
  0xda   : > { %680 = vrot.lane.b32.xlu2 %v1940_v12, %s1754_s22  ;;  %613 = vrot.lane.b32.xlu1 %v501_v15, %s1759_s23 }
  0xe0   : > { %1576 = vrot.lane.b32.xlu0 %v1575_v16, %s1755_s24 }
  0xe2   : > { %634 = vrot.lane.b32.xlu2 %v1940_v12, %s1757_s21  ;;  %1571 = vrot.lane.b32.xlu1 %v1575_v16, %s1756_s20 }
  0xe8   : > { %576 = vrot.lane.b32.xlu0 %v1931_v10, %s1758_s29 }
  0xea   : > { %609 = vrot.lane.b32.xlu2 %v1940_v12, %s1759_s23  ;;  %647 = vrot.lane.b32.xlu1 %v1931_v10, %s1757_s21 }
  0xf0   : > { %543 = vrot.lane.b32.xlu0 %v1931_v10, %s1760_s30 }
  0xf2   : > { %567 = vrot.lane.b32.xlu2 %v501_v15, %s1758_s29  ;;  %622 = vrot.lane.b32.xlu1 %v1931_v10, %s1759_s23 }
  0xf8   : > { %682 = vrot.lane.b32.xlu0 %v1937_v11, %s1754_s22 }
  0xfa   : > { %693 = vrot.lane.b32.xlu2 %v1931_v10, %s1754_s22  ;;  %1586 = vrot.lane.b32.xlu1 %v1585_v17, %s1756_s20 }
 0x100   : > { %636 = vrot.lane.b32.xlu0 %v1937_v11, %s1757_s21 }
 0x102   : > { %1581 = vrot.lane.b32.xlu2 %v1575_v16, %s1761_s11  ;;  %565 = vrot.lane.b32.xlu1 %v1937_v11, %s1758_s29  ;;  %v692_v18 = vpop.permute.xlu2 %691 }
 0x108   : > { %611 = vrot.lane.b32.xlu0 %v1937_v11, %s1759_s23 }
 0x10a   : > { %1591 = vrot.lane.b32.xlu2 %v1585_v17, %s1755_s24  ;;  %532 = vrot.lane.b32.xlu1 %v1937_v11, %s1760_s30 }
 0x10c   : > { %v2001_v19 = vpop.permute.xlu2 %1561 }
 0x10d   : > { %v1563_v50 = vunpack.i.l.bf16 %v2001_v19  ;;  %v1564_v45 = vunpack.i.h.bf16 %v2001_v19 }
 0x110   : > { %1596 = vrot.lane.b32.xlu0 %v1595_v20, %s1761_s11 }
 0x112   : > { %534 = vrot.lane.b32.xlu2 %v501_v15, %s1760_s30  ;;  %510 = vrot.lane.b32.xlu1 %v501_v15, %s1761_s11 }
 0x114   : > { %v650_v21 = vpop.permute.xlu2 %649 }
 0x11c   : > { %v2008_v22 = vpop.permute.xlu2 %624 }
 0x122   : > { %v696_v23 = vpop.permute.xlu0 %695 }
 0x124   : > { %v2010_v24 = vpop.permute.xlu2 %574  ;;  %v2012_v25 = vpop.permute.xlu1 %1566 }
 0x125   : > { %v1568_v7 = vunpack.i.l.bf16 %v2012_v25 }
 0x12a   : > { %v646_v26 = vpop.permute.xlu0 %645 }
 0x12c   : > { %v2014_v27 = vpop.permute.xlu2 %541  ;;  %v2016_v28 = vpop.permute.xlu1 %578 }
 0x132   : > { %v621_v29 = vpop.permute.xlu0 %620 }
 0x134   : > { %v2018_v30 = vpop.permute.xlu2 %680  ;;  %v2020_v31 = vpop.permute.xlu1 %545 }
 0x13a   : > { %v2022_v32 = vpop.permute.xlu0 %524 }
 0x13c   : > { %v2024_v33 = vpop.permute.xlu2 %634  ;;  %v2026_v34 = vpop.permute.xlu1 %684 }
 0x142   : > { %v2028_v35 = vpop.permute.xlu0 %563 }
 0x144   : > { %v2030_v37 = vpop.permute.xlu2 %609  ;;  %v2032_v38 = vpop.permute.xlu1 %638 }
 0x14a   : > { %v2036_v40 = vpop.permute.xlu0 %530 }
 0x14c   : > { %v2040_v43 = vpop.permute.xlu2 %567  ;;  %v2042_v44 = vpop.permute.xlu1 %613 }
 0x152   : > { %v1577_v47 = vpop.permute.xlu0 %1576 }
 0x153   : > { %v1579_v3 = vunpack.i.h.bf16 %v1577_v47  ;;  %v1578_v4 = vunpack.i.l.bf16 %v1577_v47 }
 0x154   : > { %v694_v51 = vpop.permute.xlu2 %693  ;;  %v1572_v52 = vpop.permute.xlu1 %1571 }
 0x155   : > { %v1574_v53 = vunpack.i.h.bf16 %v1572_v52  ;;  %v1573_v54 = vunpack.i.l.bf16 %v1572_v52  ;;  %v697_v55 = vsel %vm2465_vm3, %v692_v18, %v694_v51  ;;  %v698_v56 = vsel %vm2465_vm3, %v694_v51, %v696_v23  ;;  %v1183_v18 = vld [vmem:[%s2456_s7] sm:$0xff] }
 0x156   : > { %1441 = vmatpush.msk.msra.mxu2 %vm2044_vm4, %v697_v55  ;;  %1448 = vmatpush.msk.msra.mxu3 %vm2048_vm5, %v698_v56  ;;  %v605_v16 = vsel %vm594_vm11, %v1578_v4, %v1579_v3  ;;  %v606_v17 = vsel %vm594_vm11, %v1579_v3, %v1568_v7 }
 0x157   : > { %v676_v57 = vsel %vm2467_vm6, %v1573_v54, %v1574_v53  ;;  %v677_v58 = vsel %vm2467_vm6, %v1574_v53, %v1563_v50 }
 0x158   : > { %758 = vmatpush.msra.mxu2 %v676_v57  ;;  %778 = vmatpush.msra.mxu3 %v677_v58 }
 0x15a   : > { %v577_v59 = vpop.permute.xlu0 %576 }
 0x15b   : > { %v580_v20 = vsel %vm569_vm12, %v2010_v24, %v577_v59 }
 0x15c   : > { %v648_v62 = vpop.permute.xlu1 %647  ;;  %v1582_v15 = vpop.permute.xlu2 %1581 }
 0x15d   : > { %v651_v63 = vsel %vm640_vm7, %v646_v26, %v648_v62  ;;  %v652_v0 = vsel %vm640_vm7, %v648_v62, %v650_v21  ;;  %v581_v21 = vsel %vm569_vm12, %v577_v59, %v2016_v28  ;;  %v1584_v23 = vunpack.i.h.bf16 %v1582_v15 }
 0x15e   : > { %1442 = vmatpush.msk.msra.mxu2 %vm2061_vm8, %v651_v63  ;;  %1449 = vmatpush.msk.msra.mxu3 %vm2065_vm9, %v652_v0  ;;  %v1583_v26 = vunpack.i.l.bf16 %v1582_v15  ;;  %v1762_v28 = vmov 0   ;;  %v1569_v59 = vunpack.i.h.bf16 %v2012_v25 }
 0x15f   : > { %1601 = vset.pattern.permute.xlu0 %v1762_v28  ;;  %1600 = vset.pattern.permute.xlu2 %v1762_v28  ;;  %v527_v51 = vsel %vm2469_vm0, %v1584_v23, %v2022_v32 }
 0x160   : > { %v526_v50 = vsel %vm2469_vm0, %v1583_v26, %v1584_v23  ;;  %803 = vperm.xlu0 %1601, %v800_v39   ;;  %793 = vperm.xlu2 %1600, %v790_v41  }
 0x161   : > { %1647 = vset.pattern.permute.xlu1 %v1762_v28 }
 0x162   : > { %v544_v2 = vpop.permute.xlu0 %543 }
 0x163   : > { %v548_v42 = vsel %vm2470_vm14, %v544_v2, %v2020_v31  ;;  %v705_v31 = vld [vmem:[%s2450_s1] sm:$0xff] }
 0x164   : > { %v623_v5 = vpop.permute.xlu1 %622  ;;  %v1592_v55 = vpop.permute.xlu2 %1591 }
 0x165   : > { %v626_v9 = vsel %vm615_vm10, %v621_v29, %v623_v5  ;;  %v627_v13 = vsel %vm615_vm10, %v623_v5, %v2008_v22  ;;  %v1594_v56 = vunpack.i.h.bf16 %v1592_v55  ;;  %v1593_v57 = vunpack.i.l.bf16 %v1592_v55 }
 0x166   : > { %1443 = vmatpush.msk.msra.mxu2 %vm2044_vm4, %v626_v9  ;;  %1450 = vmatpush.msk.msra.mxu3 %vm2048_vm5, %v627_v13 }
 0x167   : > { %v595_v63 = vsel %vm594_vm11, %v1569_v59, %v1593_v57  ;;  %v596_v0 = vsel %vm594_vm11, %v1593_v57, %v1594_v56 }
 0x168   : > { %761 = vmatpush.msra.mxu2 %v605_v16  ;;  %781 = vmatpush.msra.mxu3 %v606_v17 }
 0x16a   : > { %v683_v29 = vpop.permute.xlu0 %682  ;;  %1444 = vmatpush.msk.msra.mxu2 %vm2061_vm8, %v580_v20  ;;  %1451 = vmatpush.msk.msra.mxu3 %vm2065_vm9, %v581_v21 }
 0x16b   : > { %v687_v36 = vsel %vm2465_vm3, %v2018_v30, %v683_v29  ;;  %v688_v24 = vsel %vm2465_vm3, %v683_v29, %v2026_v34  ;;  %v547_v34 = vsel %vm2470_vm14, %v2014_v27, %v544_v2  ;;  %vm2468_vm3 = vcmask 588800  }
 0x16c   : > { %1427 = vmatpush.msk.msra.mxu0 %vm2090_vm13, %v687_v36  ;;  %1434 = vmatpush.msk.msra.mxu1 %vm2098_vm15, %v688_v24  ;;  %v1587_v30 = vpop.permute.xlu1 %1586 }
 0x16d   : > { %v1589_v46 = vunpack.i.h.bf16 %v1587_v30  ;;  %v1588_v47 = vunpack.i.l.bf16 %v1587_v30  ;;  %1445 = vmatpush.msk.msra.mxu2 %vm2044_vm4, %v547_v34  ;;  %1452 = vmatpush.msk.msra.mxu3 %vm2048_vm5, %v548_v42 }
 0x16f   : > { %764 = vmatpush.msra.mxu2 %v526_v50  ;;  %784 = vmatpush.msra.mxu3 %v527_v51  ;;  %v666_v27 = vsel %vm2467_vm6, %v1564_v45, %v1588_v47  ;;  %v667_v19 = vsel %vm2467_vm6, %v1588_v47, %v1589_v46  ;;  %vm2147_vm6 = vcmp.ne.s32.totalorder %v399_v14, 0 }
 0x170   : > { %718 = vmatpush.msra.mxu0 %v666_v27  ;;  %738 = vmatpush.msra.mxu1 %v667_v19 }
 0x171   : > { %1446 = vmatpush.msk.msra.mxu2 %vm2061_vm8, %v1928_v8  ;;  %1453 = vmatpush.msk.msra.mxu3 %vm2065_vm9, %v1931_v10 }
 0x172   : > { %v637_v53 = vpop.permute.xlu0 %636  ;;  %1447 = vmatmul.msk.f32.vlgmr.msra.gmra.mxu2 %vm2468_vm3, %v705_v31  ;;  %1454 = vmatmul.msk.f32.vlgmr.msra.gmra.mxu3 %vm2468_vm3, %v705_v31 }
 0x173   : > { %v641_v8 = vsel %vm640_vm7, %v2024_v33, %v637_v53  ;;  %v642_v54 = vsel %vm640_vm7, %v637_v53, %v2032_v38 }
 0x174   : > { %v566_v10 = vpop.permute.xlu1 %565  ;;  %1428 = vmatpush.msk.msra.mxu0 %vm2143_vm1, %v641_v8  ;;  %1435 = vmatpush.msk.msra.mxu1 %vm2147_vm6, %v642_v54 }
 0x175   : > { %v570_v25 = vsel %vm569_vm12, %v2028_v35, %v566_v10 }
 0x17a   : > { %v612_v58 = vpop.permute.xlu0 %611 }
 0x17b   : > { %v616_v33 = vsel %vm615_vm10, %v2030_v37, %v612_v58  ;;  %v617_v38 = vsel %vm615_vm10, %v612_v58, %v2042_v44  ;;  %v571_v37 = vsel %vm569_vm12, %v566_v10, %v2040_v43  ;;  %v535_v44 = vpop.permute.xlu2 %534 }
 0x17c   : > { %v533_v62 = vpop.permute.xlu1 %532  ;;  %1429 = vmatpush.msk.msra.mxu0 %vm2090_vm13, %v616_v33  ;;  %1436 = vmatpush.msk.msra.mxu1 %vm2098_vm15, %v617_v38 }
 0x17d   : > { %v537_v1 = vsel %vm2470_vm14, %v2036_v40, %v533_v62  ;;  %v538_v2 = vsel %vm2470_vm14, %v533_v62, %v535_v44 }
 0x17e   : > { %721 = vmatpush.msra.mxu0 %v595_v63  ;;  %741 = vmatpush.msra.mxu1 %v596_v0 }
 0x180   : > { %1430 = vmatpush.msk.msra.mxu0 %vm2143_vm1, %v570_v25  ;;  %1437 = vmatpush.msk.msra.mxu1 %vm2147_vm6, %v571_v37 }
 0x182   : > { %v1597_v3 = vpop.permute.xlu0 %1596  ;;  %1431 = vmatpush.msk.msra.mxu0 %vm2090_vm13, %v537_v1  ;;  %1438 = vmatpush.msk.msra.mxu1 %vm2098_vm15, %v538_v2  ;;  %v1143_v2 = vld [vmem:[%s2454_s5] sm:$0xff] }
 0x183   : > { %v1599_v35 = vunpack.i.h.bf16 %v1597_v3  ;;  %v1598_v43 = vunpack.i.l.bf16 %v1597_v3 }
 0x184   : > { %v511_v4 = vpop.permute.xlu1 %510 }
 0x185   : > { %v513_v5 = vsel %vm2469_vm0, %v1598_v43, %v1599_v35  ;;  %v514_v6 = vsel %vm2469_vm0, %v1599_v35, %v511_v4  ;;  %v1153_v43 = vld [vmem:[%s2455_s6] sm:$0xff] }
 0x186   : > { %724 = vmatpush.msra.mxu0 %v513_v5  ;;  %744 = vmatpush.msra.mxu1 %v514_v6  ;;  %v1278_v4 = vld [vmem:[%s2458_s9] sm:$0xff] }
 0x188   : > { %1432 = vmatpush.msk.msra.mxu0 %vm2143_vm1, %v1940_v12  ;;  %1439 = vmatpush.msk.msra.mxu1 %vm2147_vm6, %v1937_v11 }
 0x189   : > { %1433 = vmatmul.msk.f32.vlgmr.msra.gmra.mxu0 %vm2468_vm3, %v705_v31  ;;  %1440 = vmatmul.msk.f32.vlgmr.msra.gmra.mxu1 %vm2468_vm3, %v705_v31  ;;  %vm2496_vm3 = vcmask 1047688  }
 0x18a   : > { %vm2497_vm0 = vmmov %vm2496_vm3 }
 0x1ba   : > { %v794_v40 = vpop.permute.xlu2 %793 }
 0x1d2   : > { %v804_v15 = vpop.permute.xlu0 %803 }
 0x1f5   : > { %v767_v7 = vpop.f32.mrf.mxu2  ;;  %v787_v9 = vpop.f32.mrf.mxu3 }
 0x1f6   : > { %v798_v13 = vmul.f32 %v794_v40, %v767_v7  ;;  %v799_v14 = vmul.f32 %v794_v40, %v787_v9 }
 0x1f8   : > { %v808_v20 = vadd.f32 %v804_v15, %v798_v13  ;;  %v809_v21 = vadd.f32 %v804_v15, %v799_v14 }
 0x1fa   : > { %v812_v24 = vadd.f32 3.0, %v808_v20  ;;  %v813_v28 = vadd.f32 3.0, %v809_v21 }
 0x1fc   : > { %v816_v42 = vmax.f32 %v812_v24, 0.0  ;;  %v817_v45 = vmax.f32 %v813_v28, 0.0 }
 0x1fe   : > { %v820_v27 = vmin.f32 %v816_v42, 6.0  ;;  %v821_v19 = vmin.f32 %v817_v45, 6.0 }
 0x200   : > { %v824_v31 = vmul.f32 %v820_v27, %v808_v20  ;;  %v825_v53 = vmul.f32 %v821_v19, %v809_v21 }
 0x202   : > { %v2205_v8 = vmul.f32 0.16666667, %v824_v31  ;;  %v2207_v54 = vmul.f32 0.16666667, %v825_v53 }
 0x206   : > { %v727_v16 = vpop.f32.mrf.mxu0  ;;  %v747_v17 = vpop.f32.mrf.mxu1 }
 0x207   : > { %v796_v23 = vmul.f32 %v794_v40, %v727_v16  ;;  %v797_v12 = vmul.f32 %v794_v40, %v747_v17 }
 0x209   : > { %v806_v26 = vadd.f32 %v804_v15, %v796_v23  ;;  %v807_v29 = vadd.f32 %v804_v15, %v797_v12 }
 0x20b   : > { %v810_v36 = vadd.f32 3.0, %v806_v26  ;;  %v811_v11 = vadd.f32 3.0, %v807_v29 }
 0x20d   : > { %v814_v39 = vmax.f32 %v810_v36, 0.0  ;;  %v815_v41 = vmax.f32 %v811_v11, 0.0 }
 0x20f   : > { %v818_v30 = vmin.f32 %v814_v39, 6.0  ;;  %v819_v34 = vmin.f32 %v815_v41, 6.0 }
 0x211   : > { %v823_v46 = vmul.f32 %v819_v34, %v807_v29  ;;  %v822_v47 = vmul.f32 %v818_v30, %v806_v26 }
 0x213   : > { %v2197_v50 = vmul.f32 0.16666667, %v823_v46  ;;  %v2199_v51 = vmul.f32 0.16666667, %v822_v47 }
 0x215   : > { %840 = vrot.lane.b32.xlu2 %v2197_v50, %s1753_s15  ;;  %838 = vrot.lane.b32.xlu1 %v2199_v51, %s1753_s15 }
 0x21d   : > { %851 = vrot.lane.b32.xlu1 %v2205_v8, %s1753_s15  ;;  %853 = vrot.lane.b32.xlu2 %v2207_v54, %s1753_s15 }
 0x26f   : > { %v841_v10 = vpop.permute.xlu2 %840 }
 0x270   : > { %848 = vst.msk [vmem:[#allocation3 + $0x10] sm:$0xff] %vm462_vm2, %v841_v10 }
 0x277   : > { %v854_v55 = vpop.permute.xlu2 %853  ;;  %v871_v56 = vld [vmem:[#allocation3 + $0x10] sm:$0xff] }
 0x278   : > { %862 = vst.msk [vmem:[#allocation3 + $0x28] sm:$0xff] %vm462_vm2, %v854_v55  ;;  %1039 = vrot.lane.b32.xlu1 %v871_v56, %s1754_s22 }
 0x27f   : > { %v872_v63 = vld [vmem:[#allocation3 + $0x28] sm:$0xff] }
 0x280   : > { %995 = vrot.lane.b32.xlu1 %v871_v56, %s1757_s21 }
 0x287   : > { %v839_v57 = vpop.permute.xlu1 %838 }
 0x288   : > { %v2218_v58 = vsel %vm462_vm2, %v839_v57, %v841_v10  ;;  %846 = vst.msk [vmem:[#allocation3] sm:$0xff] %vm2496_vm3, %v839_v57  ;;  %971 = vrot.lane.b32.xlu1 %v871_v56, %s1759_s23 }
 0x289   : > { %1037 = vrot.lane.b32.xlu0 %v2218_v58, %s1754_s22  ;;  %v1602_v59 = vpack.i.bf16 %v871_v56, %v2218_v58 }
 0x28f   : > { %v852_v33 = vpop.permute.xlu1 %851  ;;  %v2225_v38 = vld [vmem:[#allocation3] sm:$0xff] }
 0x290   : > { %v2228_v62 = vsel %vm462_vm2, %v852_v33, %v854_v55  ;;  %860 = vst.msk [vmem:[#allocation3 + $0x18] sm:$0xff] %vm2497_vm0, %v852_v33  ;;  %1035 = vrot.lane.b32.xlu2 %v2225_v38, %s1754_s22  ;;  %1603 = vrot.lane.b32.xlu1 %v1602_v59, %s1756_s20  ;;  %v1607_v0 = vpack.i.bf16 %v2225_v38, %v872_v63  ;;  %vm2498_vm2 = vcmask 769024   ;;  %vm2500_vm0 = vcmask 777216  }
 0x291   : > { %993 = vrot.lane.b32.xlu0 %v2218_v58, %s1757_s21  ;;  %vm2499_vm3 = vmmov %vm2498_vm2 }
 0x297   : > { %v2245_v25 = vld [vmem:[#allocation3 + $0x18] sm:$0xff] }
 0x298   : > { %991 = vrot.lane.b32.xlu2 %v2225_v38, %s1757_s21  ;;  %1608 = vrot.lane.b32.xlu1 %v1607_v0, %s1756_s20  ;;  %v1627_v37 = vpack.i.bf16 %v2228_v62, %v2245_v25 }
 0x299   : > { %969 = vrot.lane.b32.xlu0 %v2218_v58, %s1759_s23 }
 0x2a0   : > { %967 = vrot.lane.b32.xlu2 %v2225_v38, %s1759_s23  ;;  %1005 = vrot.lane.b32.xlu1 %v872_v63, %s1757_s21 }
 0x2a1   : > { %1045 = vrot.lane.b32.xlu0 %v2245_v25, %s1754_s22 }
 0x2a8   : > { %1049 = vrot.lane.b32.xlu2 %v872_v63, %s1754_s22  ;;  %981 = vrot.lane.b32.xlu1 %v872_v63, %s1759_s23 }
 0x2a9   : > { %1613 = vrot.lane.b32.xlu0 %v1607_v0, %s1755_s24 }
 0x2b0   : > { %1001 = vrot.lane.b32.xlu2 %v2245_v25, %s1757_s21  ;;  %937 = vrot.lane.b32.xlu1 %v872_v63, %s1758_s29 }
 0x2b1   : > { %1618 = vrot.lane.b32.xlu0 %v1607_v0, %s1761_s11 }
 0x2b8   : > { %977 = vrot.lane.b32.xlu2 %v2245_v25, %s1759_s23  ;;  %913 = vrot.lane.b32.xlu1 %v872_v63, %s1760_s30 }
 0x2b9   : > { %925 = vrot.lane.b32.xlu0 %v2218_v58, %s1758_s29 }
 0x2c0   : > { %933 = vrot.lane.b32.xlu2 %v2245_v25, %s1758_s29  ;;  %1047 = vrot.lane.b32.xlu1 %v2228_v62, %s1754_s22 }
 0x2c1   : > { %1628 = vrot.lane.b32.xlu0 %v1627_v37, %s1756_s20 }
 0x2c8   : > { %909 = vrot.lane.b32.xlu2 %v2245_v25, %s1760_s30  ;;  %1623 = vrot.lane.b32.xlu1 %v1602_v59, %s1755_s24 }
 0x2c9   : > { %1003 = vrot.lane.b32.xlu0 %v2228_v62, %s1757_s21 }
 0x2d0   : > { %923 = vrot.lane.b32.xlu2 %v2225_v38, %s1758_s29  ;;  %927 = vrot.lane.b32.xlu1 %v871_v56, %s1758_s29 }
 0x2d1   : > { %979 = vrot.lane.b32.xlu0 %v2228_v62, %s1759_s23  ;;  %s1326_s23 = scalar_lea.sflag [#allocation6], %s1906_s18 }
 0x2d8   : > { %899 = vrot.lane.b32.xlu2 %v2225_v38, %s1760_s30  ;;  %903 = vrot.lane.b32.xlu1 %v871_v56, %s1760_s30 }
 0x2d9   : > { %935 = vrot.lane.b32.xlu0 %v2228_v62, %s1758_s29  ;;  %s1341_s29 = sshll.u32 %s1338_s17, 4  ;;  %s1342_s29 = int_to_ptr.hbm [resolvable:$true] %s1341_s29 }
 0x2e0   : > { %1633 = vrot.lane.b32.xlu2 %v1627_v37, %s1755_s24  ;;  %s2516_s24 = sshll.u32 %s1906_s18, 5 }
 0x2e1   : > { %911 = vrot.lane.b32.xlu0 %v2228_v62, %s1760_s30  ;;  %s380_s20 = scalar_lea.vmem [#allocation7], %s2516_s24 }
 0x2e2   : > { %s1339_s21 = sshll.u32 %s380_s20, 4  ;;  %s1340_s21 = int_to_ptr.vmem [resolvable:$true] %s1339_s21 }
 0x2e8   : > { %1638 = vrot.lane.b32.xlu2 %v1627_v37, %s1761_s11 }
 0x2e9   : > { %901 = vrot.lane.b32.xlu0 %v2218_v58, %s1760_s30  ;;  %s1696_s30 = sshra.s32 %s1342_s29, 4  ;;  %s1697_s30 = int_to_ptr.hbm [resolvable:$true] %s1696_s30 }
 0x2ea   : > { %v1040_v44 = vpop.permute.xlu1 %1039  ;;  %v1036_v1 = vpop.permute.xlu2 %1035  ;;  %p1703_p0 = scmp.lt.s32.totalorder %s1697_s30, %s2459_s10 }
 0x2f0   : > { %1643 = vrot.lane.b32.xlu2 %v1602_v59, %s1761_s11  ;;  %s1698_s11 = scalar_lea.hbm %s1697_s30, 32 }
 0x2f1   : > { %1146 = vperm.xlu0 %1601, %v1143_v2   ;;  %p1699_p6 = scmp.ne.s32.totalorder %s1697_s30, %s1698_s11  ;;  %p1704_p1 = scmp.lt.s32.totalorder %s1702_s19, %s1698_s11 }
 0x2f2   : > { %v996_v3 = vpop.permute.xlu1 %995  ;;  %v992_v35 = vpop.permute.xlu2 %991 }
 0x2f3   : > { %p1700_p9 = pnand %p1699_p6, %p1870_p11  ;;  %p1705_p3 = por %p1704_p1, %p1703_p0 }
 0x2f5   : > { %p1701_p13 = pneg %p1700_p9 }
 0x2f7   : > { %p1706_p4 = pnand %p1705_p3, %p1701_p13 }
 0x2f8   : > { %1156 = vperm.xlu2 %1600, %v1153_v43  }
 0x2f9   : > { %1281 = vperm.xlu0 %1601, %v1278_v4  }
 0x2fa   : > { %v972_v5 = vpop.permute.xlu1 %971  ;;  %v968_v6 = vpop.permute.xlu2 %967 }
 0x2fb   : > { %v1038_v40 = vpop.permute.xlu0 %1037 }
 0x2fc   : > { %v1042_v7 = vsel %vm2498_vm2, %v1038_v40, %v1040_v44  ;;  %v1041_v9 = vsel %vm2499_vm3, %v1036_v1, %v1038_v40  ;;  %vm2501_vm2 = vmmov %vm2500_vm0 }
 0x2fd   : > { %1462 = vmatpush.msk.msrb.mxu1 %vm2098_vm15, %v1042_v7  ;;  %1455 = vmatpush.msk.msrb.mxu0 %vm2090_vm13, %v1041_v9  ;;  %vm2503_vm14 = vmmov %vm2501_vm2 }
 0x302   : > { %v1050_v13 = vpop.permute.xlu2 %1049  ;;  %v1604_v14 = vpop.permute.xlu1 %1603 }
 0x303   : > { %v1606_v15 = vunpack.i.h.bf16 %v1604_v14  ;;  %v1605_v16 = vunpack.i.l.bf16 %v1604_v14  ;;  %v994_v17 = vpop.permute.xlu0 %993 }
 0x304   : > { %v998_v21 = vsel %vm640_vm7, %v994_v17, %v996_v3  ;;  %v997_v24 = vsel %vm640_vm7, %v992_v35, %v994_v17 }
 0x305   : > { %v1022_v20 = vsel %vm2500_vm0, %v1605_v16, %v1606_v15  ;;  %vm2502_vm0 = vmmov %vm2499_vm3 }
 0x306   : > { %1091 = vmatpush.msrb.mxu1 %v1022_v20 }
 0x308   : > { %1463 = vmatpush.msk.msrb.mxu1 %vm2147_vm6, %v998_v21 }
 0x30a   : > { %v1002_v23 = vpop.permute.xlu2 %1001  ;;  %v1609_v12 = vpop.permute.xlu1 %1608 }
 0x30b   : > { %v1611_v26 = vunpack.i.h.bf16 %v1609_v12  ;;  %v970_v29 = vpop.permute.xlu0 %969  ;;  %v1610_v59 = vunpack.i.l.bf16 %v1609_v12 }
 0x30c   : > { %v974_v36 = vsel %vm615_vm10, %v970_v29, %v972_v5  ;;  %v973_v28 = vsel %vm615_vm10, %v968_v6, %v970_v29 }
 0x30d   : > { %v1021_v11 = vsel %vm2501_vm2, %v1611_v26, %v1605_v16  ;;  %1464 = vmatpush.msk.msrb.mxu1 %vm2098_vm15, %v974_v36  ;;  %v1268_v36 = vld [vmem:[%s2457_s8] sm:$0xff] }
 0x30e   : > { %1071 = vmatpush.msrb.mxu0 %v1021_v11  ;;  %1271 = vperm.xlu1 %1647, %v1268_v36  }
 0x310   : > { %1456 = vmatpush.msk.msrb.mxu0 %vm2143_vm1, %v997_v24 }
 0x312   : > { %v978_v39 = vpop.permute.xlu2 %977  ;;  %v1006_v41 = vpop.permute.xlu1 %1005  ;;  %1457 = vmatpush.msk.msrb.mxu0 %vm2090_vm13, %v973_v28 }
 0x313   : > { %v1046_v30 = vpop.permute.xlu0 %1045 }
 0x31a   : > { %v934_v34 = vpop.permute.xlu2 %933  ;;  %v982_v42 = vpop.permute.xlu1 %981 }
 0x31b   : > { %v1614_v45 = vpop.permute.xlu0 %1613 }
 0x31c   : > { %v1616_v2 = vunpack.i.h.bf16 %v1614_v45  ;;  %v1615_v20 = vunpack.i.l.bf16 %v1614_v45 }
 0x322   : > { %v2319_v46 = vpop.permute.xlu2 %909  ;;  %v938_v47 = vpop.permute.xlu1 %937 }
 0x323   : > { %v2321_v27 = vpop.permute.xlu0 %1618 }
 0x32a   : > { %v914_v19 = vpop.permute.xlu1 %913  ;;  %v924_v31 = vpop.permute.xlu2 %923 }
 0x32b   : > { %v926_v53 = vpop.permute.xlu0 %925 }
 0x32c   : > { %v929_v9 = vsel %vm569_vm12, %v924_v31, %v926_v53 }
 0x332   : > { %v1048_v10 = vpop.permute.xlu1 %1047  ;;  %v2329_v0 = vpop.permute.xlu2 %899 }
 0x333   : > { %v1051_v55 = vsel %vm2499_vm3, %v1046_v30, %v1048_v10  ;;  %v1052_v56 = vsel %vm2502_vm0, %v1048_v10, %v1050_v13  ;;  %v1629_v57 = vpop.permute.xlu0 %1628  ;;  %v1059_v10 = vld [vmem:[%s2453_s4] sm:$0xff] }
 0x334   : > { %1469 = vmatpush.msk.msrb.mxu2 %vm2044_vm4, %v1051_v55  ;;  %1476 = vmatpush.msk.msrb.mxu3 %vm2048_vm5, %v1052_v56  ;;  %v1631_v33 = vunpack.i.h.bf16 %v1629_v57  ;;  %v1630_v63 = vunpack.i.l.bf16 %v1629_v57  ;;  %v1621_v55 = vunpack.i.h.bf16 %v2321_v27 }
 0x336   : > { %v1031_v37 = vsel %vm2501_vm2, %v1630_v63, %v1631_v33  ;;  %v1032_v44 = vsel %vm2503_vm14, %v1631_v33, %v1610_v59 }
 0x337   : > { %1111 = vmatpush.msrb.mxu2 %v1031_v37  ;;  %1131 = vmatpush.msrb.mxu3 %v1032_v44 }
 0x33a   : > { %v1624_v1 = vpop.permute.xlu1 %1623  ;;  %v1634_v7 = vpop.permute.xlu2 %1633 }
 0x33b   : > { %v1626_v3 = vunpack.i.h.bf16 %v1624_v1  ;;  %v1625_v35 = vunpack.i.l.bf16 %v1624_v1  ;;  %v1004_v43 = vpop.permute.xlu0 %1003  ;;  %v1636_v13 = vunpack.i.h.bf16 %v1634_v7  ;;  %v1635_v14 = vunpack.i.l.bf16 %v1634_v7 }
 0x33c   : > { %v1007_v4 = vsel %vm640_vm7, %v1002_v23, %v1004_v43  ;;  %v1008_v5 = vsel %vm640_vm7, %v1004_v43, %v1006_v41  ;;  %vm2504_vm7 = vcmask 1031168  }
 0x33d   : > { %v953_v6 = vsel %vm594_vm11, %v1616_v2, %v1625_v35  ;;  %v954_v40 = vsel %vm594_vm11, %v1625_v35, %v1626_v3  ;;  %1470 = vmatpush.msk.msrb.mxu2 %vm2061_vm8, %v1007_v4  ;;  %1477 = vmatpush.msk.msrb.mxu3 %vm2065_vm9, %v1008_v5  ;;  %v963_v12 = vsel %vm594_vm11, %v1635_v14, %v1636_v13  ;;  %vm2511_vm14 = vmmov %vm2504_vm7 }
 0x33e   : > { %1074 = vmatpush.msrb.mxu0 %v953_v6  ;;  %1094 = vmatpush.msrb.mxu1 %v954_v40  ;;  %v964_v26 = vsel %vm594_vm11, %v1636_v13, %v1615_v20  ;;  %vm2506_vm11 = vcmask 1039360  }
 0x340   : > { %1458 = vmatpush.msk.msrb.mxu0 %vm2143_vm1, %v929_v9 }
 0x342   : > { %v928_v15 = vpop.permute.xlu1 %927  ;;  %v1639_v28 = vpop.permute.xlu2 %1638 }
 0x343   : > { %v930_v16 = vsel %vm569_vm12, %v926_v53, %v928_v15  ;;  %v980_v17 = vpop.permute.xlu0 %979  ;;  %v1640_v41 = vunpack.i.l.bf16 %v1639_v28 }
 0x344   : > { %1465 = vmatpush.msk.msrb.mxu1 %vm2147_vm6, %v930_v16  ;;  %v983_v21 = vsel %vm615_vm10, %v978_v39, %v980_v17  ;;  %v984_v23 = vsel %vm615_vm10, %v980_v17, %v982_v42  ;;  %v1641_v39 = vunpack.i.h.bf16 %v1639_v28  ;;  %v1620_v42 = vunpack.i.l.bf16 %v2321_v27  ;;  %vm2505_vm10 = vmmov %vm2504_vm7 }
 0x345   : > { %1471 = vmatpush.msk.msrb.mxu2 %vm2044_vm4, %v983_v21  ;;  %1478 = vmatpush.msk.msrb.mxu3 %vm2048_vm5, %v984_v23 }
 0x347   : > { %1114 = vmatpush.msrb.mxu2 %v963_v12  ;;  %1134 = vmatpush.msrb.mxu3 %v964_v26 }
 0x34a   : > { %v1644_v53 = vpop.permute.xlu2 %1643 }
 0x34b   : > { %v936_v29 = vpop.permute.xlu0 %935  ;;  %v1646_v48 = vunpack.i.h.bf16 %v1644_v53  ;;  %v1645_v49 = vunpack.i.l.bf16 %v1644_v53 }
 0x34c   : > { %v939_v11 = vsel %vm569_vm12, %v934_v34, %v936_v29  ;;  %v940_v24 = vsel %vm569_vm12, %v936_v29, %v938_v47  ;;  %v895_v47 = vsel %vm2506_vm11, %v1640_v41, %v1641_v39  ;;  %vm2507_vm12 = vmmov %vm2506_vm11 }
 0x34d   : > { %1472 = vmatpush.msk.msrb.mxu2 %vm2061_vm8, %v939_v11  ;;  %1479 = vmatpush.msk.msrb.mxu3 %vm2065_vm9, %v940_v24  ;;  %v896_v31 = vsel %vm2507_vm12, %v1641_v39, %v1620_v42 }
 0x353   : > { %v912_v30 = vpop.permute.xlu0 %911 }
 0x354   : > { %v915_v45 = vsel %vm2504_vm7, %v2319_v46, %v912_v30  ;;  %v916_v34 = vsel %vm2505_vm10, %v912_v30, %v914_v19  ;;  %v904_v46 = vpop.permute.xlu1 %903 }
 0x355   : > { %1473 = vmatpush.msk.msrb.mxu2 %vm2044_vm4, %v915_v45  ;;  %1480 = vmatpush.msk.msrb.mxu3 %vm2048_vm5, %v916_v34  ;;  %vm2508_vm4 = vcmask 588800  }
 0x356   : > { %vm2509_vm5 = vmmov %vm2508_vm4 }
 0x357   : > { %1117 = vmatpush.msrb.mxu2 %v895_v47  ;;  %1137 = vmatpush.msrb.mxu3 %v896_v31  ;;  %vm2515_vm0 = vmmov %vm2508_vm4 }
 0x359   : > { %1474 = vmatpush.msk.msrb.mxu2 %vm2061_vm8, %v2245_v25  ;;  %1481 = vmatpush.msk.msrb.mxu3 %vm2065_vm9, %v2228_v62  ;;  %vm2510_vm8 = vmmov %vm2504_vm7 }
 0x35a   : > { %1475 = vmatmul.msk.f32.vlgmr.msrb.gmra.mxu2 %vm2508_vm4, %v1059_v10  ;;  %1482 = vmatmul.msk.f32.vlgmr.msrb.gmra.mxu3 %vm2509_vm5, %v1059_v10  ;;  %vm2512_vm9 = vmmov %vm2506_vm11 }
 0x35b   : > { %1243 = vmatpush.msra.mxu2 %v2205_v8  ;;  %1263 = vmatpush.msra.mxu3 %v2207_v54  ;;  %v902_v19 = vpop.permute.xlu0 %901  ;;  %v882_v62 = vsel %vm2512_vm9, %v1621_v55, %v1645_v49  ;;  %vm2513_vm3 = vmmov %vm2512_vm9  ;;  %v1157_v54 = vpop.permute.xlu2 %1156 }
 0x35c   : > { %v905_v60 = vsel %vm2510_vm8, %v2329_v0, %v902_v19  ;;  %v906_v61 = vsel %vm2511_vm14, %v902_v19, %v904_v46  ;;  %v883_v8 = vsel %vm2513_vm3, %v1645_v49, %v1646_v48 }
 0x35d   : > { %1459 = vmatpush.msk.msrb.mxu0 %vm2090_vm13, %v905_v60  ;;  %1466 = vmatpush.msk.msrb.mxu1 %vm2098_vm15, %v906_v61  ;;  %vm1184_vm13 = vcmask 64512   ;;  %vm2514_vm15 = vmmov %vm2508_vm4 }
 0x35f   : > { %1077 = vmatpush.msrb.mxu0 %v882_v62  ;;  %1097 = vmatpush.msrb.mxu1 %v883_v8 }
 0x361   : > { %1460 = vmatpush.msk.msrb.mxu0 %vm2143_vm1, %v2225_v38  ;;  %1467 = vmatpush.msk.msrb.mxu1 %vm2147_vm6, %v2218_v58 }
 0x362   : > { %1461 = vmatmul.msk.f32.vlgmr.msrb.gmra.mxu0 %vm2514_vm15, %v1059_v10  ;;  %1468 = vmatmul.msk.f32.vlgmr.msrb.gmra.mxu1 %vm2515_vm0, %v1059_v10 }
 0x363   : > { %1203 = vmatpush.msra.mxu0 %v2199_v51  ;;  %1223 = vmatpush.msra.mxu1 %v2197_v50  ;;  %v1147_v22 = vpop.permute.xlu0 %1146 }
 0x364   : > { %1485 = vmatmul.msk.f32.vlgmr.msra.gmra.mxu2 %vm1184_vm13, %v1183_v18  ;;  %1486 = vmatmul.msk.f32.vlgmr.msra.gmra.mxu3 %vm1184_vm13, %v1183_v18 }
 0x36a   : > { %1483 = vmatmul.msk.f32.vlgmr.msra.gmra.mxu0 %vm1184_vm13, %v1183_v18  ;;  %1484 = vmatmul.msk.f32.vlgmr.msra.gmra.mxu1 %vm1184_vm13, %v1183_v18 }
 0x36b   : > { %v1282_v14 = vpop.permute.xlu0 %1281 }
 0x380   : > { %v1272_v1 = vpop.permute.xlu1 %1271 }
 0x3dd   : > { %v1120_v32 = vpop.f32.mrf.mxu2  ;;  %v1140_v52 = vpop.f32.mrf.mxu3 }
 0x3de   : > { %v1151_v58 = vmul.f32 %v1147_v22, %v1120_v32  ;;  %v1152_v38 = vmul.f32 %v1147_v22, %v1140_v52 }
 0x3df   : > { %v1080_v25 = vpop.f32.mrf.mxu0  ;;  %v1100_v27 = vpop.f32.mrf.mxu1 }
 0x3e0   : > { %v1161_v56 = vadd.f32 %v1157_v54, %v1151_v58  ;;  %v1162_v57 = vadd.f32 %v1157_v54, %v1152_v38  ;;  %v1149_v59 = vmul.f32 %v1147_v22, %v1080_v25  ;;  %v1150_v33 = vmul.f32 %v1147_v22, %v1100_v27 }
 0x3e2   : > { %v1159_v63 = vadd.f32 %v1157_v54, %v1149_v59  ;;  %v1160_v51 = vadd.f32 %v1157_v54, %v1150_v33  ;;  %v1165_v0 = vadd.f32 3.0, %v1161_v56  ;;  %v1166_v50 = vadd.f32 3.0, %v1162_v57 }
 0x3e4   : > { %v1163_v37 = vadd.f32 3.0, %v1159_v63  ;;  %v1164_v44 = vadd.f32 3.0, %v1160_v51  ;;  %v1169_v35 = vmax.f32 %v1165_v0, 0.0  ;;  %v1170_v43 = vmax.f32 %v1166_v50, 0.0  ;;  %v1649_v0 = vld [vmem:[%s1912_s28 + $0x18] sm:$0xff] }
 0x3e6   : > { %v1167_v4 = vmax.f32 %v1163_v37, 0.0  ;;  %v1168_v15 = vmax.f32 %v1164_v44, 0.0  ;;  %v1173_v23 = vmin.f32 %v1169_v35, 6.0  ;;  %v1174_v12 = vmin.f32 %v1170_v43, 6.0  ;;  %v1650_v37 = vld [vmem:[%s1912_s28] sm:$0xff] }
 0x3e7   : > { %v1245_v2 = vpop.f32.mrf.mxu2  ;;  %v1265_v3 = vpop.f32.mrf.mxu3 }
 0x3e8   : > { %v1205_v5 = vpop.f32.mrf.mxu0  ;;  %v1225_v6 = vpop.f32.mrf.mxu1  ;;  %v1276_v40 = vmul.f32 %v1272_v1, %v1245_v2  ;;  %v1277_v7 = vmul.f32 %v1272_v1, %v1265_v3  ;;  %v1171_v26 = vmin.f32 %v1167_v4, 6.0  ;;  %v1172_v28 = vmin.f32 %v1168_v15, 6.0 }
 0x3e9   : > { %v1274_v9 = vmul.f32 %v1272_v1, %v1205_v5  ;;  %v1275_v13 = vmul.f32 %v1272_v1, %v1225_v6  ;;  %v1177_v45 = vmul.f32 %v1173_v23, %v1161_v56  ;;  %v1178_v34 = vmul.f32 %v1174_v12, %v1162_v57  ;;  %v1651_v1 = vld [vmem:[%s1912_s28 + $0x8] sm:$0xff] }
 0x3ea   : > { %v1286_v16 = vadd.f32 %v1282_v14, %v1276_v40  ;;  %v1287_v17 = vadd.f32 %v1282_v14, %v1277_v7  ;;  %v1175_v47 = vmul.f32 %v1171_v26, %v1159_v63  ;;  %v1176_v49 = vmul.f32 %v1172_v28, %v1160_v51  ;;  %v1648_v63 = vld [vmem:[%s1912_s28 + $0x10] sm:$0xff] }
 0x3eb   : > { %v1284_v20 = vadd.f32 %v1282_v14, %v1274_v9  ;;  %v1285_v21 = vadd.f32 %v1282_v14, %v1275_v13  ;;  %v1181_v61 = vmul.f32 0.16666667, %v1177_v45  ;;  %v1182_v62 = vmul.f32 0.16666667, %v1178_v34 }
 0x3ec   : > { %v1290_v29 = vadd.f32 3.0, %v1286_v16  ;;  %v1291_v36 = vadd.f32 3.0, %v1287_v17  ;;  %v1179_v8 = vmul.f32 0.16666667, %v1175_v47  ;;  %v1180_v52 = vmul.f32 0.16666667, %v1176_v49 }
 0x3ed   : > { %v1288_v11 = vadd.f32 3.0, %v1284_v20  ;;  %v1289_v24 = vadd.f32 3.0, %v1285_v21 }
 0x3ee   : > { %v1294_v39 = vmax.f32 %v1290_v29, 0.0  ;;  %v1295_v41 = vmax.f32 %v1291_v36, 0.0 }
 0x3ef   : > { %v1292_v30 = vmax.f32 %v1288_v11, 0.0  ;;  %v1293_v42 = vmax.f32 %v1289_v24, 0.0 }
 0x3f0   : > { %v1298_v31 = vmin.f32 %v1294_v39, 6.0  ;;  %v1299_v53 = vmin.f32 %v1295_v41, 6.0 }
 0x3f1   : > { %v1296_v10 = vmin.f32 %v1292_v30, 6.0  ;;  %v1297_v48 = vmin.f32 %v1293_v42, 6.0 }
 0x3f2   : > { %v1302_v46 = vmul.f32 %v1298_v31, %v1286_v16  ;;  %v1303_v19 = vmul.f32 %v1299_v53, %v1287_v17 }
 0x3f3   : > { %v1300_v55 = vmul.f32 %v1296_v10, %v1284_v20  ;;  %v1301_v60 = vmul.f32 %v1297_v48, %v1285_v21 }
 0x3f4   : > { %v1306_v18 = vmul.f32 0.16666667, %v1302_v46  ;;  %v1307_v22 = vmul.f32 0.16666667, %v1303_v19 }
 0x3f5   : > { %v1304_v32 = vmul.f32 0.16666667, %v1300_v55  ;;  %v1305_v54 = vmul.f32 0.16666667, %v1301_v60 }
 0x3f6   : > { %v1310_v58 = vadd.f32 %v1306_v18, %v1181_v61  ;;  %v1311_v38 = vadd.f32 %v1307_v22, %v1182_v62 }
 0x3f7   : > { %v1308_v25 = vadd.f32 %v1304_v32, %v1179_v8  ;;  %v1309_v27 = vadd.f32 %v1305_v54, %v1180_v52 }
 0x3f8   : > { %v1314_v56 = vmax.f32 %v1310_v58, 0.0  ;;  %v1315_v57 = vmax.f32 %v1311_v38, 0.0 }
 0x3f9   : > { %v1312_v59 = vmax.f32 %v1308_v25, 0.0  ;;  %v1313_v33 = vmax.f32 %v1309_v27, 0.0 }
 0x3fa   : > { %v1320_v51 = vadd.f32 %v1648_v63, %v1314_v56  ;;  %v1321_v50 = vadd.f32 %v1649_v0, %v1315_v57 }
 0x3fb   : > { %v1316_v44 = vadd.f32 %v1650_v37, %v1312_v59  ;;  %v1317_v2 = vadd.f32 %v1651_v1, %v1313_v33 }
 0x3fc   : > { %1487 = vst [vmem:[%s380_s20 + $0x10] sm:$0xff] %v1320_v51 }
 0x3fd   : > { %1488 = vst [vmem:[%s380_s20 + $0x18] sm:$0xff] %v1321_v50 }
 0x3fe   : > { %1318 = vst [vmem:[%s380_s20] sm:$0xff] %v1316_v44 }
 0x3ff   : > { %1319 = vst [vmem:[%s380_s20 + $0x8] sm:$0xff] %v1317_v2 }
 0x400   : > { %1709 = shalt.err (!%p1706_p4)
}
 0x401   : > { %s1763_s18 = smov 256   ;;  %s1764_s15 = smov 16  }
 0x402   : > { %1501 = dma.vmem_to_hbm [thread:$0]  (%p1870_p11), %s1340_s21, 512, %s1342_s29, %s1326_s23, %s1763_s18, %s1763_s18, %s1764_s15  }
 0x403 PF: > { %s1356_s17 = sand.u32 1, %s1736_s13   ;;  %p2518_p7 = scmp.ge.s32.totalorder %s1748_s16, 2 }
 0x404   : > { %s1357_s24 = scalar_lea.sflag [#allocation6], %s1356_s17 }
 0x405   : > { %p1508_p5 = pnand %p2518_p7, %p1874_p12 }
 0x407   : > { %p1509_p8 = pneg %p1508_p5 }
 0x409   : > { %1731 = dma.done.wait (%p1509_p8), %s1357_s24, 512  }
 0x40a   : > { %1733 = vsyncadd (%p1509_p8), %s1357_s24, 4294966784  ;;  %s2519_s16 = sld [smem:[#allocation11_spill]]  ;;  %s2522_s13 = smov %s1740_s14 }
 0x40b   : > { %s2520_s20 = sld [smem:[#allocation10_spill]] }
 0x40c   : > { %s2521_s15 = sld [smem:[#allocation12_spill]] }
 0x410   : > { %p23_p10 = scmp.ge.s32.totalorder %s2519_s16, 4  }
 0x411   : > { %s2523_s14 = smov %s2520_s20 }
 0x412   :  { %25 = sbr.rel (!%p23_p10) target bundleno = 5 (0x5), region = 109 }
 0x417   :  { %1363 = vsyncpa [#allocation5], 1 }
 0x418   :  { %1365 = vsyncpa [#allocation5 + $0x1], 1 }
 0x419   :  { %1366 = vsyncpa [#allocation6], 1 }
 0x41a   :  { %1368 = vsyncpa [#allocation6 + $0x1], 1 }

</bundles_post_ra>
